<compile_context>
chip_gen: v6e
topology: v6e:2x2x1
jax: 0.10.0
libtpu: 0.0.40
codegen_flags: <defaults>
</compile_context>

<pallas_src>
import jax
import jax.numpy as jnp
import numpy as np
from jax import lax
from jax.experimental import pallas as pl
from jax.experimental.pallas import tpu as pltpu

LRELU_SLOPE = 0.1


def get_padding(kernel_size, dilation=1):
    return (kernel_size * dilation - dilation) // 2


def _lrelu(v):
    return jnp.where(v >= 0, v, LRELU_SLOPE * v)


def _round_up(v, m):
    return -(-v // m) * m


# -----------------------------------------------------------------------------
# Fused ResBlock1 kernel: one (time-tile, batch) grid point runs all 3 pairs.
# -----------------------------------------------------------------------------
def _make_fused_kernel(TT, HT, DMAX, dilations, C, T_true, has_mask,
                       compute_dtype):
    """Window layout (rows): [ left halo HT | tile TT | right halo HT ].
    Window row r <-> global time row0 - HT + r, row0 = program_id(0) * TT.
    Each pair shrinks the exact region by d_i+1 rows per side; the halo HT =
    sum(d_i+1) covers all three pairs, so the central TT rows are exact."""
    WH = TT + 2 * HT
    K = 3

    def kernel(*refs):
        if has_mask:
            (x_ref, xl_ref, xr_ref, m_ref,
             w1_ref, b1_ref, w2_ref, b2_ref, out_ref, abuf, zbuf) = refs
        else:
            (x_ref, xl_ref, xr_ref,
             w1_ref, b1_ref, w2_ref, b2_ref, out_ref, abuf, zbuf) = refs

        # Zero the fixed "same"-padding rows of the im2col staging buffers once.
        abuf[0:DMAX, :] = jnp.zeros((DMAX, C), compute_dtype)
        abuf[DMAX + WH:, :] = jnp.zeros((DMAX, C), compute_dtype)
        zbuf[0:1, :] = jnp.zeros((1, C), compute_dtype)
        zbuf[1 + WH:, :] = jnp.zeros((1, C), compute_dtype)

        # Running activation over the halo'd window, carried in f32.
        cur = jnp.concatenate([xl_ref[...], x_ref[...], xr_ref[...]],
                              axis=0).astype(jnp.float32)

        if has_mask:
            # Mask window already holds zeros for global rows outside [0, T).
            mw = m_ref[...].astype(jnp.float32)                     # (WH, 1)

            def gate(v):                                            # lrelu * mask
                return _lrelu(v) * mw
        else:
            # Zero out-of-range rows so both convs see the reference's zero pad.
            row0 = pl.program_id(0) * TT
            gidx = lax.broadcasted_iota(jnp.int32, (WH, 1), 0) + (row0 - HT)
            validcol = jnp.logical_and(gidx >= 0, gidx < T_true)

            def gate(v):
                return jnp.where(validcol, _lrelu(v), 0.0)

        for i, d in enumerate(dilations):
            # ---- conv1 (kernel 3, dilation d): im2col over zero-padded buf ----
            abuf[DMAX:DMAX + WH, :] = gate(cur).astype(compute_dtype)
            lhs1 = jnp.concatenate(
                [abuf[DMAX + (k - 1) * d: DMAX + (k - 1) * d + WH, :]
                 for k in range(K)], axis=1)                        # (WH, 3C)
            z = jnp.dot(lhs1, w1_ref[i], preferred_element_type=jnp.float32)
            z = z + b1_ref[i].astype(jnp.float32)

            # ---- conv2 (kernel 3, dilation 1) + residual ----
            zbuf[1:1 + WH, :] = gate(z).astype(compute_dtype)
            lhs2 = jnp.concatenate(
                [zbuf[k:k + WH, :] for k in range(K)], axis=1)      # (WH, 3C)
            y = jnp.dot(lhs2, w2_ref[i], preferred_element_type=jnp.float32)
            cur = cur + y + b2_ref[i].astype(jnp.float32)

        # TODO(synk): for C < 128 (late HiFi-GAN stages) fold 128//C time rows
        # into the lane dim of the output block so stores are lane-dense.
        out_ref[...] = cur[HT:HT + TT, :].astype(out_ref.dtype)

    return kernel


# -----------------------------------------------------------------------------
# Channels-last wrapper (one pallas_call per ResBlock1 forward)
# -----------------------------------------------------------------------------
def res_block1_nlc(x, params, x_mask=None, dilations=(1, 3, 5), tile_t=None,
                   compute_dtype=jnp.bfloat16):
    """x: (B, T, C) channels-last.  x_mask: (B, 1, T), (B, T) or None."""
    B, T, C = x.shape
    compute_dtype = jnp.dtype(compute_dtype)
    n_pairs = len(dilations)
    K = 3
    HT = sum(d + 1 for d in dilations)           # per-side halo (12 for 1,3,5)
    DMAX = max(dilations)

    # Time tile: scale with C so TT*C ~ 256K elements (amortises per-step
    # overhead), never below the halo, never (much) beyond the sequence.
    if tile_t is None:
        tile_t = max(256, min(4096, (1 << 18) // max(C, 1)))
    TT = _round_up(max(min(tile_t, _round_up(T, 8)), HT), 8)
    nT = -(-T // TT)
    if B == 1 and nT > 1 and nT % 2 == 1:
        nT += 1                                  # even tile count: v7x 2-TC balance
    Tpad = nT * TT
    WH = TT + 2 * HT

    xw = jnp.pad(x, ((0, 0), (0, Tpad - T), (0, 0))) if Tpad != T else x
    x4 = xw.reshape(B, nT, TT, C)

    # Halo side inputs: HT rows of the ORIGINAL input from each neighbour tile
    # (zeros at the sequence edges == the convs' "same" zero padding).
    zeros_h = jnp.zeros((B, 1, HT, C), x4.dtype)
    left = jnp.concatenate([zeros_h, x4[:, :-1, TT - HT:, :]], axis=1)
    right = jnp.concatenate([x4[:, 1:, :HT, :], zeros_h], axis=1)

    has_mask = x_mask is not None
    if has_mask:
        m = x_mask.reshape(B, -1)[:, :T].astype(x.dtype)             # (B, T)
        mp = jnp.pad(m, ((0, 0), (HT, HT + Tpad - T)))               # 0 outside [0,T)
        idx = jnp.arange(nT)[:, None] * TT + jnp.arange(WH)[None, :]
        mwin = mp[:, idx][..., None]                                 # (B,nT,WH,1)

    # Pack weights once into im2col layout: (n_pairs, K*C, C), compute dtype.
    def pack_w(lst):
        return jnp.stack([jnp.transpose(w, (2, 1, 0)).reshape(K * C, C)
                          for (w, _) in lst]).astype(compute_dtype)

    def pack_b(lst):
        return jnp.stack([b.reshape(1, C) for (_, b) in lst]).astype(jnp.float32)

    w1, b1 = pack_w(params["convs1"]), pack_b(params["convs1"])
    w2, b2 = pack_w(params["convs2"]), pack_b(params["convs2"])

    kernel = _make_fused_kernel(TT, HT, DMAX, tuple(dilations), C, T,
                                has_mask, compute_dtype)

    tile_map = lambda t, b: (b, t, 0, 0)
    const_w = lambda t, b: (0, 0, 0)

    in_specs = [
        pl.BlockSpec((None, None, TT, C), tile_map),    # current tile (residual)
        pl.BlockSpec((None, None, HT, C), tile_map),    # left halo
        pl.BlockSpec((None, None, HT, C), tile_map),    # right halo
    ]
    args = [x4, left, right]
    if has_mask:
        in_specs.append(pl.BlockSpec((None, None, WH, 1), tile_map))
        args.append(mwin)
    # TODO(synk): pipeline_mode=pl.Buffered(1) on these resident weight specs
    # would halve their VMEM footprint (matters on v7x's 64 MiB VMEM).
    in_specs += [
        pl.BlockSpec((n_pairs, K * C, C), const_w),     # conv1 weights (resident)
        pl.BlockSpec((n_pairs, 1, C), const_w),         # conv1 biases
        pl.BlockSpec((n_pairs, K * C, C), const_w),     # conv2 weights (resident)
        pl.BlockSpec((n_pairs, 1, C), const_w),         # conv2 biases
    ]
    args += [w1, b1, w2, b2]

    out = pl.pallas_call(
        kernel,
        out_shape=jax.ShapeDtypeStruct((B, nT, TT, C), x.dtype),
        grid=(nT, B),                                    # time-major grid
        in_specs=in_specs,
        out_specs=pl.BlockSpec((None, None, TT, C), tile_map),
        scratch_shapes=[
            pltpu.VMEM((WH + 2 * DMAX, C), compute_dtype),  # conv1 im2col staging
            pltpu.VMEM((WH + 2, C), compute_dtype),         # conv2 im2col staging
        ],
        compiler_params=pltpu.CompilerParams(
            dimension_semantics=("parallel", "parallel"),
            vmem_limit_bytes=56 * 1024 * 1024,
        ),
    )(*args)

    y = out.reshape(B, Tpad, C)[:, :T, :]
    if has_mask:
        y = y * m[..., None]
    return y


def res_block1(x_nct, params, x_mask=None, dilations=(1, 3, 5), tile_t=None,
               compute_dtype=jnp.bfloat16):
    """PyTorch-layout wrapper: x_nct (B, C, T), x_mask (B, 1, T) or None.
    In a full Generator keep everything channels-last (res_block1_nlc) so the
    transposes below are hoisted/amortised across the whole network."""
    x = jnp.transpose(x_nct, (0, 2, 1))
    y = res_block1_nlc(x, params, x_mask, dilations, tile_t, compute_dtype)
    return jnp.transpose(y, (0, 2, 1))


# -----------------------------------------------------------------------------
# Pure-JAX reference (for correctness check)
# -----------------------------------------------------------------------------
def _ref_conv1d(x_nct, w_pt, b, dil):
    pad = get_padding(w_pt.shape[-1], dil)
    y = lax.conv_general_dilated(
        x_nct, w_pt, window_strides=(1,), padding=[(pad, pad)],
        rhs_dilation=(dil,), dimension_numbers=("NCH", "OIH", "NCH"))
    return y + b[None, :, None]


def ref_res_block1(x, params, x_mask=None, dilations=(1, 3, 5)):
    for i, d in enumerate(dilations):
        w1, b1 = params["convs1"][i]
        w2, b2 = params["convs2"][i]
        xt = _lrelu(x)
        if x_mask is not None:
            xt = xt * x_mask
        xt = _ref_conv1d(xt, w1, b1, d)
        xt = _lrelu(xt)
        if x_mask is not None:
            xt = xt * x_mask
        xt = _ref_conv1d(xt, w2, b2, 1)
        x = xt + x
    if x_mask is not None:
        x = x * x_mask
    return x


# -----------------------------------------------------------------------------
# Deterministic synthetic parameters (weight_norm collapses to plain weights at
# init since g = ||v||, so draw N(0, 0.01) weights like init_weights does).
# -----------------------------------------------------------------------------
def init_params(key, channels, kernel_size=3, n_layers=3):
    params = {"convs1": [], "convs2": []}
    for name in ("convs1", "convs2"):
        for _ in range(n_layers):
            key, kw, kb = jax.random.split(key, 3)
            w = 0.01 * jax.random.normal(
                kw, (channels, channels, kernel_size), jnp.float32)
            b = 0.01 * jax.random.normal(kb, (channels,), jnp.float32)
            params[name].append((w, b))
    return params


if __name__ == "__main__":
    key = jax.random.PRNGKey(0)
    B, C = 2, 16
    dilations = (1, 3, 5)
    key, kp = jax.random.split(key)
    params = init_params(kp, C)

    # --- 1) no mask, f32 compute, multi-tile (halos + leading-edge fix) ------
    T = 48
    key, kx = jax.random.split(key)
    x = jax.random.normal(kx, (B, C, T), jnp.float32)
    out = jax.block_until_ready(
        res_block1(x, params, None, dilations, tile_t=16,
                   compute_dtype=jnp.float32))
    ref = jax.block_until_ready(ref_res_block1(x, params, None, dilations))
    assert out.shape == (B, C, T)
    np.testing.assert_allclose(np.asarray(out), np.asarray(ref),
                               atol=3e-4, rtol=1e-3)

    # --- 2) with mask and ragged T (zero-extension + out-of-range handling) --
    T2 = 50
    key, kx2 = jax.random.split(key)
    x2 = jax.random.normal(kx2, (B, C, T2), jnp.float32)
    lengths = jnp.array([50, 33], jnp.int32)
    x_mask = (jnp.arange(T2)[None, :] < lengths[:, None]
              ).astype(jnp.float32)[:, None, :]
    out2 = jax.block_until_ready(
        res_block1(x2, params, x_mask, dilations, tile_t=16,
                   compute_dtype=jnp.float32))
    ref2 = jax.block_until_ready(ref_res_block1(x2, params, x_mask, dilations))
    np.testing.assert_allclose(np.asarray(out2), np.asarray(ref2),
                               atol=3e-4, rtol=1e-3)

    # --- 3) default path: bf16 MXU compute (f32 accumulation), auto tile -----
    out3 = jax.block_until_ready(res_block1(x, params, None, dilations))
    np.testing.assert_allclose(np.asarray(out3), np.asarray(ref),
                               atol=2e-2, rtol=2e-2)

    print("KERNEL_OK")
</pallas_src>

<mosaic_0001>
module attributes {stable_mosaic.version = 11 : i64} {
  func.func @kernel(%arg0: i32, %arg1: i32, %arg2: memref<1x1x16x16xf32, #tpu.memory_space<vmem>>, %arg3: memref<1x1x12x16xf32, #tpu.memory_space<vmem>>, %arg4: memref<1x1x12x16xf32, #tpu.memory_space<vmem>>, %arg5: memref<3x48x16xf32, #tpu.memory_space<vmem>>, %arg6: memref<3x1x16xf32, #tpu.memory_space<vmem>>, %arg7: memref<3x48x16xf32, #tpu.memory_space<vmem>>, %arg8: memref<3x1x16xf32, #tpu.memory_space<vmem>>, %arg9: memref<1x1x16x16xf32, #tpu.memory_space<vmem>>, %arg10: memref<50x16xf32, #tpu.memory_space<vmem>>, %arg11: memref<42x16xf32, #tpu.memory_space<vmem>>) attributes {dimension_semantics = [#tpu.dimension_semantics<parallel>, #tpu.dimension_semantics<parallel>], iteration_bounds = array<i64: 3, 2>, scalar_prefetch = 0 : i64, scratch_operands = 2 : i64, tpu.core_type = #tpu.core_type<tc>, window_params = [{transform_indices = @transform_0, window_bounds = array<i64: 1, 1, 16, 16>}, {transform_indices = @transform_1, window_bounds = array<i64: 1, 1, 12, 16>}, {transform_indices = @transform_2, window_bounds = array<i64: 1, 1, 12, 16>}, {pipeline_mode = #tpu.pipeline_mode<synchronous>, transform_indices = @transform_3, window_bounds = array<i64: 3, 48, 16>}, {pipeline_mode = #tpu.pipeline_mode<synchronous>, transform_indices = @transform_4, window_bounds = array<i64: 3, 1, 16>}, {pipeline_mode = #tpu.pipeline_mode<synchronous>, transform_indices = @transform_5, window_bounds = array<i64: 3, 48, 16>}, {pipeline_mode = #tpu.pipeline_mode<synchronous>, transform_indices = @transform_6, window_bounds = array<i64: 3, 1, 16>}, {transform_indices = @transform_7, window_bounds = array<i64: 1, 1, 16, 16>}]} {
    %cst = arith.constant 0.000000e+00 : f32
    %0 = vector.broadcast %cst : f32 to vector<5x16xf32>
    %c0 = arith.constant 0 : index
    %c0_0 = arith.constant 0 : index
    %1 = vector.load %arg10[%c0, %c0_0] : memref<50x16xf32, #tpu.memory_space<vmem>>, vector<5x16xf32>
    tpu.vector_store %arg10[%c0, %c0_0], %0 {strides = array<i32>} : memref<50x16xf32, #tpu.memory_space<vmem>>, vector<5x16xf32>,
    %cst_1 = arith.constant 0.000000e+00 : f32
    %2 = vector.broadcast %cst_1 : f32 to vector<5x16xf32>
    %c45 = arith.constant 45 : index
    %c0_2 = arith.constant 0 : index
    %3 = vector.load %arg10[%c45, %c0_2] : memref<50x16xf32, #tpu.memory_space<vmem>>, vector<5x16xf32>
    tpu.vector_store %arg10[%c45, %c0_2], %2 {strides = array<i32>} : memref<50x16xf32, #tpu.memory_space<vmem>>, vector<5x16xf32>,
    %cst_3 = arith.constant 0.000000e+00 : f32
    %4 = vector.broadcast %cst_3 : f32 to vector<1x16xf32>
    %c0_4 = arith.constant 0 : index
    %c0_5 = arith.constant 0 : index
    %5 = vector.load %arg11[%c0_4, %c0_5] : memref<42x16xf32, #tpu.memory_space<vmem>>, vector<1x16xf32>
    tpu.vector_store %arg11[%c0_4, %c0_5], %4 {strides = array<i32>} : memref<42x16xf32, #tpu.memory_space<vmem>>, vector<1x16xf32>,
    %cst_6 = arith.constant 0.000000e+00 : f32
    %6 = vector.broadcast %cst_6 : f32 to vector<1x16xf32>
    %c41 = arith.constant 41 : index
    %c0_7 = arith.constant 0 : index
    %7 = vector.load %arg11[%c41, %c0_7] : memref<42x16xf32, #tpu.memory_space<vmem>>, vector<1x16xf32>
    tpu.vector_store %arg11[%c41, %c0_7], %6 {strides = array<i32>} : memref<42x16xf32, #tpu.memory_space<vmem>>, vector<1x16xf32>,
    %c0_8 = arith.constant 0 : index
    %c0_9 = arith.constant 0 : index
    %c0_10 = arith.constant 0 : index
    %c0_11 = arith.constant 0 : index
    %8 = vector.load %arg3[%c0_8, %c0_9, %c0_10, %c0_11] : memref<1x1x12x16xf32, #tpu.memory_space<vmem>>, vector<1x1x12x16xf32>
    %9 = vector.shape_cast %8 : vector<1x1x12x16xf32> to vector<12x16xf32>
    %c0_12 = arith.constant 0 : index
    %c0_13 = arith.constant 0 : index
    %c0_14 = arith.constant 0 : index
    %c0_15 = arith.constant 0 : index
    %10 = vector.load %arg2[%c0_12, %c0_13, %c0_14, %c0_15] : memref<1x1x16x16xf32, #tpu.memory_space<vmem>>, vector<1x1x16x16xf32>
    %11 = vector.shape_cast %10 : vector<1x1x16x16xf32> to vector<16x16xf32>
    %c0_16 = arith.constant 0 : index
    %c0_17 = arith.constant 0 : index
    %c0_18 = arith.constant 0 : index
    %c0_19 = arith.constant 0 : index
    %12 = vector.load %arg4[%c0_16, %c0_17, %c0_18, %c0_19] : memref<1x1x12x16xf32, #tpu.memory_space<vmem>>, vector<1x1x12x16xf32>
    %13 = vector.shape_cast %12 : vector<1x1x12x16xf32> to vector<12x16xf32>
    %14 = tpu.concatenate %9, %11, %13 in 0 : vector<12x16xf32>, vector<16x16xf32>, vector<12x16xf32> -> vector<40x16xf32>
    %c16_i32 = arith.constant 16 : i32
    %15 = arith.muli %arg0, %c16_i32 : i32
    %16 = tpu.iota {dimensions = array<i32: 0>} : vector<40x1xi32>
    %c12_i32 = arith.constant 12 : i32
    %17 = arith.subi %15, %c12_i32 : i32
    %18 = vector.broadcast %17 : i32 to vector<40x1xi32>
    %19 = arith.addi %16, %18 : vector<40x1xi32>
    %c0_i32 = arith.constant 0 : i32
    %20 = vector.broadcast %c0_i32 : i32 to vector<40x1xi32>
    %21 = arith.cmpi sge, %19, %20 : vector<40x1xi32>
    %c48_i32 = arith.constant 48 : i32
    %22 = vector.broadcast %c48_i32 : i32 to vector<40x1xi32>
    %23 = arith.cmpi slt, %19, %22 : vector<40x1xi32>
    %24 = arith.andi %21, %23 : vector<40x1xi1>
    %cst_20 = arith.constant 0.000000e+00 : f32
    %25 = vector.broadcast %cst_20 : f32 to vector<40x16xf32>
    %26 = arith.cmpf oge, %14, %25 : vector<40x16xf32>
    %cst_21 = arith.constant 1.000000e-01 : f32
    %27 = vector.broadcast %cst_21 : f32 to vector<40x16xf32>
    %28 = arith.mulf %27, %14 : vector<40x16xf32>
    %29 = arith.select %26, %14, %28 : vector<40x16xi1>, vector<40x16xf32>
    %cst_22 = arith.constant 0.000000e+00 : f32
    %30 = vector.shape_cast %24 : vector<40x1xi1> to vector<40x1xi1>
    %31 = vector.broadcast %30 : vector<40x1xi1> to vector<40x16xi1>
    %32 = vector.broadcast %cst_22 : f32 to vector<40x16xf32>
    %33 = arith.select %31, %29, %32 : vector<40x16xi1>, vector<40x16xf32>
    %c5 = arith.constant 5 : index
    %c0_23 = arith.constant 0 : index
    %34 = vector.load %arg10[%c5, %c0_23] : memref<50x16xf32, #tpu.memory_space<vmem>>, vector<40x16xf32>
    tpu.vector_store %arg10[%c5, %c0_23], %33 {strides = array<i32>} : memref<50x16xf32, #tpu.memory_space<vmem>>, vector<40x16xf32>,
    %c4 = arith.constant 4 : index
    %c0_24 = arith.constant 0 : index
    %35 = vector.load %arg10[%c4, %c0_24] : memref<50x16xf32, #tpu.memory_space<vmem>>, vector<40x16xf32>
    %c5_25 = arith.constant 5 : index
    %c0_26 = arith.constant 0 : index
    %36 = vector.load %arg10[%c5_25, %c0_26] : memref<50x16xf32, #tpu.memory_space<vmem>>, vector<40x16xf32>
    %c6 = arith.constant 6 : index
    %c0_27 = arith.constant 0 : index
    %37 = vector.load %arg10[%c6, %c0_27] : memref<50x16xf32, #tpu.memory_space<vmem>>, vector<40x16xf32>
    %38 = tpu.concatenate %35, %36, %37 in 1 : vector<40x16xf32>, vector<40x16xf32>, vector<40x16xf32> -> vector<40x48xf32>
    %c0_28 = arith.constant 0 : index
    %c0_29 = arith.constant 0 : index
    %c0_30 = arith.constant 0 : index
    %39 = vector.load %arg5[%c0_28, %c0_29, %c0_30] : memref<3x48x16xf32, #tpu.memory_space<vmem>>, vector<1x48x16xf32>
    %40 = vector.shape_cast %39 : vector<1x48x16xf32> to vector<48x16xf32>
    %cst_31 = arith.constant dense<0.000000e+00> : vector<40x16xf32>
    %41 = tpu.matmul %38, %40, %cst_31 {dimension_numbers = #tpu.dot_dimension_numbers<[1], [0], [0], [1], [0, 0, 1, 1], [], []>} : vector<40x48xf32>, vector<48x16xf32>, vector<40x16xf32> -> vector<40x16xf32>
    %c0_32 = arith.constant 0 : index
    %c0_33 = arith.constant 0 : index
    %c0_34 = arith.constant 0 : index
    %42 = vector.load %arg6[%c0_32, %c0_33, %c0_34] : memref<3x1x16xf32, #tpu.memory_space<vmem>>, vector<1x1x16xf32>
    %43 = vector.shape_cast %42 : vector<1x1x16xf32> to vector<1x16xf32>
    %44 = vector.broadcast %43 : vector<1x16xf32> to vector<40x16xf32>
    %45 = arith.addf %41, %44 : vector<40x16xf32>
    %cst_35 = arith.constant 0.000000e+00 : f32
    %46 = vector.broadcast %cst_35 : f32 to vector<40x16xf32>
    %47 = arith.cmpf oge, %45, %46 : vector<40x16xf32>
    %cst_36 = arith.constant 1.000000e-01 : f32
    %48 = vector.broadcast %cst_36 : f32 to vector<40x16xf32>
    %49 = arith.mulf %48, %45 : vector<40x16xf32>
    %50 = arith.select %47, %45, %49 : vector<40x16xi1>, vector<40x16xf32>
    %cst_37 = arith.constant 0.000000e+00 : f32
    %51 = vector.shape_cast %24 : vector<40x1xi1> to vector<40x1xi1>
    %52 = vector.broadcast %51 : vector<40x1xi1> to vector<40x16xi1>
    %53 = vector.broadcast %cst_37 : f32 to vector<40x16xf32>
    %54 = arith.select %52, %50, %53 : vector<40x16xi1>, vector<40x16xf32>
    %c1 = arith.constant 1 : index
    %c0_38 = arith.constant 0 : index
    %55 = vector.load %arg11[%c1, %c0_38] : memref<42x16xf32, #tpu.memory_space<vmem>>, vector<40x16xf32>
    tpu.vector_store %arg11[%c1, %c0_38], %54 {strides = array<i32>} : memref<42x16xf32, #tpu.memory_space<vmem>>, vector<40x16xf32>,
    %c0_39 = arith.constant 0 : index
    %c0_40 = arith.constant 0 : index
    %56 = vector.load %arg11[%c0_39, %c0_40] : memref<42x16xf32, #tpu.memory_space<vmem>>, vector<40x16xf32>
    %c1_41 = arith.constant 1 : index
    %c0_42 = arith.constant 0 : index
    %57 = vector.load %arg11[%c1_41, %c0_42] : memref<42x16xf32, #tpu.memory_space<vmem>>, vector<40x16xf32>
    %c2 = arith.constant 2 : index
    %c0_43 = arith.constant 0 : index
    %58 = vector.load %arg11[%c2, %c0_43] : memref<42x16xf32, #tpu.memory_space<vmem>>, vector<40x16xf32>
    %59 = tpu.concatenate %56, %57, %58 in 1 : vector<40x16xf32>, vector<40x16xf32>, vector<40x16xf32> -> vector<40x48xf32>
    %c0_44 = arith.constant 0 : index
    %c0_45 = arith.constant 0 : index
    %c0_46 = arith.constant 0 : index
    %60 = vector.load %arg7[%c0_44, %c0_45, %c0_46] : memref<3x48x16xf32, #tpu.memory_space<vmem>>, vector<1x48x16xf32>
    %61 = vector.shape_cast %60 : vector<1x48x16xf32> to vector<48x16xf32>
    %cst_47 = arith.constant dense<0.000000e+00> : vector<40x16xf32>
    %62 = tpu.matmul %59, %61, %cst_47 {dimension_numbers = #tpu.dot_dimension_numbers<[1], [0], [0], [1], [0, 0, 1, 1], [], []>} : vector<40x48xf32>, vector<48x16xf32>, vector<40x16xf32> -> vector<40x16xf32>
    %63 = arith.addf %14, %62 : vector<40x16xf32>
    %c0_48 = arith.constant 0 : index
    %c0_49 = arith.constant 0 : index
    %c0_50 = arith.constant 0 : index
    %64 = vector.load %arg8[%c0_48, %c0_49, %c0_50] : memref<3x1x16xf32, #tpu.memory_space<vmem>>, vector<1x1x16xf32>
    %65 = vector.shape_cast %64 : vector<1x1x16xf32> to vector<1x16xf32>
    %66 = vector.broadcast %65 : vector<1x16xf32> to vector<40x16xf32>
    %67 = arith.addf %63, %66 : vector<40x16xf32>
    %cst_51 = arith.constant 0.000000e+00 : f32
    %68 = vector.broadcast %cst_51 : f32 to vector<40x16xf32>
    %69 = arith.cmpf oge, %67, %68 : vector<40x16xf32>
    %cst_52 = arith.constant 1.000000e-01 : f32
    %70 = vector.broadcast %cst_52 : f32 to vector<40x16xf32>
    %71 = arith.mulf %70, %67 : vector<40x16xf32>
    %72 = arith.select %69, %67, %71 : vector<40x16xi1>, vector<40x16xf32>
    %cst_53 = arith.constant 0.000000e+00 : f32
    %73 = vector.shape_cast %24 : vector<40x1xi1> to vector<40x1xi1>
    %74 = vector.broadcast %73 : vector<40x1xi1> to vector<40x16xi1>
    %75 = vector.broadcast %cst_53 : f32 to vector<40x16xf32>
    %76 = arith.select %74, %72, %75 : vector<40x16xi1>, vector<40x16xf32>
    %c5_54 = arith.constant 5 : index
    %c0_55 = arith.constant 0 : index
    %77 = vector.load %arg10[%c5_54, %c0_55] : memref<50x16xf32, #tpu.memory_space<vmem>>, vector<40x16xf32>
    tpu.vector_store %arg10[%c5_54, %c0_55], %76 {strides = array<i32>} : memref<50x16xf32, #tpu.memory_space<vmem>>, vector<40x16xf32>,
    %c2_56 = arith.constant 2 : index
    %c0_57 = arith.constant 0 : index
    %78 = vector.load %arg10[%c2_56, %c0_57] : memref<50x16xf32, #tpu.memory_space<vmem>>, vector<40x16xf32>
    %c5_58 = arith.constant 5 : index
    %c0_59 = arith.constant 0 : index
    %79 = vector.load %arg10[%c5_58, %c0_59] : memref<50x16xf32, #tpu.memory_space<vmem>>, vector<40x16xf32>
    %c8 = arith.constant 8 : index
    %c0_60 = arith.constant 0 : index
    %80 = vector.load %arg10[%c8, %c0_60] : memref<50x16xf32, #tpu.memory_space<vmem>>, vector<40x16xf32>
    %81 = tpu.concatenate %78, %79, %80 in 1 : vector<40x16xf32>, vector<40x16xf32>, vector<40x16xf32> -> vector<40x48xf32>
    %c1_61 = arith.constant 1 : index
    %c0_62 = arith.constant 0 : index
    %c0_63 = arith.constant 0 : index
    %82 = vector.load %arg5[%c1_61, %c0_62, %c0_63] : memref<3x48x16xf32, #tpu.memory_space<vmem>>, vector<1x48x16xf32>
    %83 = vector.shape_cast %82 : vector<1x48x16xf32> to vector<48x16xf32>
    %cst_64 = arith.constant dense<0.000000e+00> : vector<40x16xf32>
    %84 = tpu.matmul %81, %83, %cst_64 {dimension_numbers = #tpu.dot_dimension_numbers<[1], [0], [0], [1], [0, 0, 1, 1], [], []>} : vector<40x48xf32>, vector<48x16xf32>, vector<40x16xf32> -> vector<40x16xf32>
    %c1_65 = arith.constant 1 : index
    %c0_66 = arith.constant 0 : index
    %c0_67 = arith.constant 0 : index
    %85 = vector.load %arg6[%c1_65, %c0_66, %c0_67] : memref<3x1x16xf32, #tpu.memory_space<vmem>>, vector<1x1x16xf32>
    %86 = vector.shape_cast %85 : vector<1x1x16xf32> to vector<1x16xf32>
    %87 = vector.broadcast %86 : vector<1x16xf32> to vector<40x16xf32>
    %88 = arith.addf %84, %87 : vector<40x16xf32>
    %cst_68 = arith.constant 0.000000e+00 : f32
    %89 = vector.broadcast %cst_68 : f32 to vector<40x16xf32>
    %90 = arith.cmpf oge, %88, %89 : vector<40x16xf32>
    %cst_69 = arith.constant 1.000000e-01 : f32
    %91 = vector.broadcast %cst_69 : f32 to vector<40x16xf32>
    %92 = arith.mulf %91, %88 : vector<40x16xf32>
    %93 = arith.select %90, %88, %92 : vector<40x16xi1>, vector<40x16xf32>
    %cst_70 = arith.constant 0.000000e+00 : f32
    %94 = vector.shape_cast %24 : vector<40x1xi1> to vector<40x1xi1>
    %95 = vector.broadcast %94 : vector<40x1xi1> to vector<40x16xi1>
    %96 = vector.broadcast %cst_70 : f32 to vector<40x16xf32>
    %97 = arith.select %95, %93, %96 : vector<40x16xi1>, vector<40x16xf32>
    %c1_71 = arith.constant 1 : index
    %c0_72 = arith.constant 0 : index
    %98 = vector.load %arg11[%c1_71, %c0_72] : memref<42x16xf32, #tpu.memory_space<vmem>>, vector<40x16xf32>
    tpu.vector_store %arg11[%c1_71, %c0_72], %97 {strides = array<i32>} : memref<42x16xf32, #tpu.memory_space<vmem>>, vector<40x16xf32>,
    %c0_73 = arith.constant 0 : index
    %c0_74 = arith.constant 0 : index
    %99 = vector.load %arg11[%c0_73, %c0_74] : memref<42x16xf32, #tpu.memory_space<vmem>>, vector<40x16xf32>
    %c1_75 = arith.constant 1 : index
    %c0_76 = arith.constant 0 : index
    %100 = vector.load %arg11[%c1_75, %c0_76] : memref<42x16xf32, #tpu.memory_space<vmem>>, vector<40x16xf32>
    %c2_77 = arith.constant 2 : index
    %c0_78 = arith.constant 0 : index
    %101 = vector.load %arg11[%c2_77, %c0_78] : memref<42x16xf32, #tpu.memory_space<vmem>>, vector<40x16xf32>
    %102 = tpu.concatenate %99, %100, %101 in 1 : vector<40x16xf32>, vector<40x16xf32>, vector<40x16xf32> -> vector<40x48xf32>
    %c1_79 = arith.constant 1 : index
    %c0_80 = arith.constant 0 : index
    %c0_81 = arith.constant 0 : index
    %103 = vector.load %arg7[%c1_79, %c0_80, %c0_81] : memref<3x48x16xf32, #tpu.memory_space<vmem>>, vector<1x48x16xf32>
    %104 = vector.shape_cast %103 : vector<1x48x16xf32> to vector<48x16xf32>
    %cst_82 = arith.constant dense<0.000000e+00> : vector<40x16xf32>
    %105 = tpu.matmul %102, %104, %cst_82 {dimension_numbers = #tpu.dot_dimension_numbers<[1], [0], [0], [1], [0, 0, 1, 1], [], []>} : vector<40x48xf32>, vector<48x16xf32>, vector<40x16xf32> -> vector<40x16xf32>
    %106 = arith.addf %67, %105 : vector<40x16xf32>
    %c1_83 = arith.constant 1 : index
    %c0_84 = arith.constant 0 : index
    %c0_85 = arith.constant 0 : index
    %107 = vector.load %arg8[%c1_83, %c0_84, %c0_85] : memref<3x1x16xf32, #tpu.memory_space<vmem>>, vector<1x1x16xf32>
    %108 = vector.shape_cast %107 : vector<1x1x16xf32> to vector<1x16xf32>
    %109 = vector.broadcast %108 : vector<1x16xf32> to vector<40x16xf32>
    %110 = arith.addf %106, %109 : vector<40x16xf32>
    %cst_86 = arith.constant 0.000000e+00 : f32
    %111 = vector.broadcast %cst_86 : f32 to vector<40x16xf32>
    %112 = arith.cmpf oge, %110, %111 : vector<40x16xf32>
    %cst_87 = arith.constant 1.000000e-01 : f32
    %113 = vector.broadcast %cst_87 : f32 to vector<40x16xf32>
    %114 = arith.mulf %113, %110 : vector<40x16xf32>
    %115 = arith.select %112, %110, %114 : vector<40x16xi1>, vector<40x16xf32>
    %cst_88 = arith.constant 0.000000e+00 : f32
    %116 = vector.shape_cast %24 : vector<40x1xi1> to vector<40x1xi1>
    %117 = vector.broadcast %116 : vector<40x1xi1> to vector<40x16xi1>
    %118 = vector.broadcast %cst_88 : f32 to vector<40x16xf32>
    %119 = arith.select %117, %115, %118 : vector<40x16xi1>, vector<40x16xf32>
    %c5_89 = arith.constant 5 : index
    %c0_90 = arith.constant 0 : index
    %120 = vector.load %arg10[%c5_89, %c0_90] : memref<50x16xf32, #tpu.memory_space<vmem>>, vector<40x16xf32>
    tpu.vector_store %arg10[%c5_89, %c0_90], %119 {strides = array<i32>} : memref<50x16xf32, #tpu.memory_space<vmem>>, vector<40x16xf32>,
    %c0_91 = arith.constant 0 : index
    %c0_92 = arith.constant 0 : index
    %121 = vector.load %arg10[%c0_91, %c0_92] : memref<50x16xf32, #tpu.memory_space<vmem>>, vector<40x16xf32>
    %c5_93 = arith.constant 5 : index
    %c0_94 = arith.constant 0 : index
    %122 = vector.load %arg10[%c5_93, %c0_94] : memref<50x16xf32, #tpu.memory_space<vmem>>, vector<40x16xf32>
    %c10 = arith.constant 10 : index
    %c0_95 = arith.constant 0 : index
    %123 = vector.load %arg10[%c10, %c0_95] : memref<50x16xf32, #tpu.memory_space<vmem>>, vector<40x16xf32>
    %124 = tpu.concatenate %121, %122, %123 in 1 : vector<40x16xf32>, vector<40x16xf32>, vector<40x16xf32> -> vector<40x48xf32>
    %c2_96 = arith.constant 2 : index
    %c0_97 = arith.constant 0 : index
    %c0_98 = arith.constant 0 : index
    %125 = vector.load %arg5[%c2_96, %c0_97, %c0_98] : memref<3x48x16xf32, #tpu.memory_space<vmem>>, vector<1x48x16xf32>
    %126 = vector.shape_cast %125 : vector<1x48x16xf32> to vector<48x16xf32>
    %cst_99 = arith.constant dense<0.000000e+00> : vector<40x16xf32>
    %127 = tpu.matmul %124, %126, %cst_99 {dimension_numbers = #tpu.dot_dimension_numbers<[1], [0], [0], [1], [0, 0, 1, 1], [], []>} : vector<40x48xf32>, vector<48x16xf32>, vector<40x16xf32> -> vector<40x16xf32>
    %c2_100 = arith.constant 2 : index
    %c0_101 = arith.constant 0 : index
    %c0_102 = arith.constant 0 : index
    %128 = vector.load %arg6[%c2_100, %c0_101, %c0_102] : memref<3x1x16xf32, #tpu.memory_space<vmem>>, vector<1x1x16xf32>
    %129 = vector.shape_cast %128 : vector<1x1x16xf32> to vector<1x16xf32>
    %130 = vector.broadcast %129 : vector<1x16xf32> to vector<40x16xf32>
    %131 = arith.addf %127, %130 : vector<40x16xf32>
    %cst_103 = arith.constant 0.000000e+00 : f32
    %132 = vector.broadcast %cst_103 : f32 to vector<40x16xf32>
    %133 = arith.cmpf oge, %131, %132 : vector<40x16xf32>
    %cst_104 = arith.constant 1.000000e-01 : f32
    %134 = vector.broadcast %cst_104 : f32 to vector<40x16xf32>
    %135 = arith.mulf %134, %131 : vector<40x16xf32>
    %136 = arith.select %133, %131, %135 : vector<40x16xi1>, vector<40x16xf32>
    %cst_105 = arith.constant 0.000000e+00 : f32
    %137 = vector.shape_cast %24 : vector<40x1xi1> to vector<40x1xi1>
    %138 = vector.broadcast %137 : vector<40x1xi1> to vector<40x16xi1>
    %139 = vector.broadcast %cst_105 : f32 to vector<40x16xf32>
    %140 = arith.select %138, %136, %139 : vector<40x16xi1>, vector<40x16xf32>
    %c1_106 = arith.constant 1 : index
    %c0_107 = arith.constant 0 : index
    %141 = vector.load %arg11[%c1_106, %c0_107] : memref<42x16xf32, #tpu.memory_space<vmem>>, vector<40x16xf32>
    tpu.vector_store %arg11[%c1_106, %c0_107], %140 {strides = array<i32>} : memref<42x16xf32, #tpu.memory_space<vmem>>, vector<40x16xf32>,
    %c0_108 = arith.constant 0 : index
    %c0_109 = arith.constant 0 : index
    %142 = vector.load %arg11[%c0_108, %c0_109] : memref<42x16xf32, #tpu.memory_space<vmem>>, vector<40x16xf32>
    %c1_110 = arith.constant 1 : index
    %c0_111 = arith.constant 0 : index
    %143 = vector.load %arg11[%c1_110, %c0_111] : memref<42x16xf32, #tpu.memory_space<vmem>>, vector<40x16xf32>
    %c2_112 = arith.constant 2 : index
    %c0_113 = arith.constant 0 : index
    %144 = vector.load %arg11[%c2_112, %c0_113] : memref<42x16xf32, #tpu.memory_space<vmem>>, vector<40x16xf32>
    %145 = tpu.concatenate %142, %143, %144 in 1 : vector<40x16xf32>, vector<40x16xf32>, vector<40x16xf32> -> vector<40x48xf32>
    %c2_114 = arith.constant 2 : index
    %c0_115 = arith.constant 0 : index
    %c0_116 = arith.constant 0 : index
    %146 = vector.load %arg7[%c2_114, %c0_115, %c0_116] : memref<3x48x16xf32, #tpu.memory_space<vmem>>, vector<1x48x16xf32>
    %147 = vector.shape_cast %146 : vector<1x48x16xf32> to vector<48x16xf32>
    %cst_117 = arith.constant dense<0.000000e+00> : vector<40x16xf32>
    %148 = tpu.matmul %145, %147, %cst_117 {dimension_numbers = #tpu.dot_dimension_numbers<[1], [0], [0], [1], [0, 0, 1, 1], [], []>} : vector<40x48xf32>, vector<48x16xf32>, vector<40x16xf32> -> vector<40x16xf32>
    %149 = arith.addf %110, %148 : vector<40x16xf32>
    %c2_118 = arith.constant 2 : index
    %c0_119 = arith.constant 0 : index
    %c0_120 = arith.constant 0 : index
    %150 = vector.load %arg8[%c2_118, %c0_119, %c0_120] : memref<3x1x16xf32, #tpu.memory_space<vmem>>, vector<1x1x16xf32>
    %151 = vector.shape_cast %150 : vector<1x1x16xf32> to vector<1x16xf32>
    %152 = vector.broadcast %151 : vector<1x16xf32> to vector<40x16xf32>
    %153 = arith.addf %149, %152 : vector<40x16xf32>
    %154 = vector.extract_strided_slice %153 {offsets = [12, 0], sizes = [16, 16], strides = [1, 1]} : vector<40x16xf32> to vector<16x16xf32>
    %c0_121 = arith.constant 0 : index
    %c0_122 = arith.constant 0 : index
    %c0_123 = arith.constant 0 : index
    %c0_124 = arith.constant 0 : index
    %155 = vector.load %arg9[%c0_121, %c0_122, %c0_123, %c0_124] : memref<1x1x16x16xf32, #tpu.memory_space<vmem>>, vector<1x1x16x16xf32>
    %156 = vector.shape_cast %155 : vector<1x1x16x16xf32> to vector<16x16xf32>
    %157 = vector.shape_cast %154 : vector<16x16xf32> to vector<1x1x16x16xf32>
    tpu.vector_store %arg9[%c0_121, %c0_122, %c0_123, %c0_124], %157 {strides = array<i32>} : memref<1x1x16x16xf32, #tpu.memory_space<vmem>>, vector<1x1x16x16xf32>,
    return
  }
  func.func @transform_0(%arg0: i32, %arg1: i32) -> (i32, i32, i32, i32) {
    %c0_i32 = arith.constant 0 : i32
    %c0_i32_0 = arith.constant 0 : i32
    %c0_i32_1 = arith.constant 0 : i32
    return %arg1, %arg0, %c0_i32, %c0_i32_0 : i32, i32, i32, i32
  }
  func.func @transform_1(%arg0: i32, %arg1: i32) -> (i32, i32, i32, i32) {
    %c0_i32 = arith.constant 0 : i32
    %c0_i32_0 = arith.constant 0 : i32
    %c0_i32_1 = arith.constant 0 : i32
    return %arg1, %arg0, %c0_i32, %c0_i32_0 : i32, i32, i32, i32
  }
  func.func @transform_2(%arg0: i32, %arg1: i32) -> (i32, i32, i32, i32) {
    %c0_i32 = arith.constant 0 : i32
    %c0_i32_0 = arith.constant 0 : i32
    %c0_i32_1 = arith.constant 0 : i32
    return %arg1, %arg0, %c0_i32, %c0_i32_0 : i32, i32, i32, i32
  }
  func.func @transform_3(%arg0: i32, %arg1: i32) -> (i32, i32, i32) {
    %c0_i32 = arith.constant 0 : i32
    %c0_i32_0 = arith.constant 0 : i32
    %c0_i32_1 = arith.constant 0 : i32
    %c0_i32_2 = arith.constant 0 : i32
    return %c0_i32, %c0_i32_0, %c0_i32_1 : i32, i32, i32
  }
  func.func @transform_4(%arg0: i32, %arg1: i32) -> (i32, i32, i32) {
    %c0_i32 = arith.constant 0 : i32
    %c0_i32_0 = arith.constant 0 : i32
    %c0_i32_1 = arith.constant 0 : i32
    %c0_i32_2 = arith.constant 0 : i32
    return %c0_i32, %c0_i32_0, %c0_i32_1 : i32, i32, i32
  }
  func.func @transform_5(%arg0: i32, %arg1: i32) -> (i32, i32, i32) {
    %c0_i32 = arith.constant 0 : i32
    %c0_i32_0 = arith.constant 0 : i32
    %c0_i32_1 = arith.constant 0 : i32
    %c0_i32_2 = arith.constant 0 : i32
    return %c0_i32, %c0_i32_0, %c0_i32_1 : i32, i32, i32
  }
  func.func @transform_6(%arg0: i32, %arg1: i32) -> (i32, i32, i32) {
    %c0_i32 = arith.constant 0 : i32
    %c0_i32_0 = arith.constant 0 : i32
    %c0_i32_1 = arith.constant 0 : i32
    %c0_i32_2 = arith.constant 0 : i32
    return %c0_i32, %c0_i32_0, %c0_i32_1 : i32, i32, i32
  }
  func.func @transform_7(%arg0: i32, %arg1: i32) -> (i32, i32, i32, i32) {
    %c0_i32 = arith.constant 0 : i32
    %c0_i32_0 = arith.constant 0 : i32
    %c0_i32_1 = arith.constant 0 : i32
    return %arg1, %arg0, %c0_i32, %c0_i32_0 : i32, i32, i32, i32
  }
}

</mosaic_0001>

<bundles_post_ra>
// kernel: tpu_custom_call.1
= control target key start
LH: loop header
LB: loop body
LE: loop exit
PB: predicated region body
PF: predicated region fallthrough
CT: control target
= control target key end

     0   :  { %12 = vsyncpa [#allocation5], 0  ;;  %s3133_s0 = inlined_call_operand.vmem [shape: f32[2,3,16,16], index: 0, kind: input, shape index: {}]   ;;  %s3134_s1 = inlined_call_operand.vmem [shape: f32[2,3,12,16], index: 1, kind: input, shape index: {}]   ;;  %s3135_s2 = inlined_call_operand.vmem [shape: f32[2,3,12,16], index: 2, kind: input, shape index: {}]   ;;  %s3136_s3 = inlined_call_operand.vmem [shape: f32[3,48,16], index: 3, kind: input, shape index: {}]   ;;  %s3137_s4 = inlined_call_operand.vmem [shape: f32[3,1,16], index: 4, kind: input, shape index: {}]   ;;  %s3138_s5 = inlined_call_operand.vmem [shape: f32[3,48,16], index: 5, kind: input, shape index: {}]   ;;  %s3139_s6 = inlined_call_operand.vmem [shape: f32[3,1,16], index: 6, kind: input, shape index: {}]   ;;  %s3140_s7 = inlined_call_operand.hbm [shape: f32[2,3,16,16], index: 7, kind: output, shape index: {}]  }
   0x1   :  { %14 = vsyncpa [#allocation5 + $0x1], 0  ;;  %s2404_s24 = smov 0   ;;  %s2406_s25 = smov 0  }
   0x2   :  { %s2408_s26 = smov 0   ;;  %s2410_s27 = smov 0  }
   0x3   :  { %s2412_s28 = smov 0   ;;  %s2414_s29 = smov 0  }
   0x4   :  { %s2416_s30 = smov 0   ;;  %s2418_s8 = smov 0  }
   0x5 LB: > { %s1873_s9 = sadd.s32 4294967295, %s2355_s8   ;;  %s1874_s10 = sadd.s32 4294967294, %s2355_s8   ;;  %s2355_s8 = sphi %s2418_s8, %s20_s8   ;;  %s2351_s30 = sphi %s2416_s30, %s3165_s30   ;;  %s2347_s29 = sphi %s2414_s29, %s3164_s29   ;;  %s2343_s28 = sphi %s2412_s28, %s3163_s28   ;;  %s2339_s27 = sphi %s2410_s27, %s3162_s27   ;;  %s2335_s26 = sphi %s2408_s26, %s3161_s26   ;;  %s2331_s25 = sphi %s2406_s25, %s3160_s25   ;;  %s2327_s24 = sphi %s2404_s24, %s3159_s24  }
   0x6   : > { %s29_s11 = sadd.s32 1, %s2347_s29  ;;  %s32_s12 = sadd.s32 1, %s2351_s30 }
   0x7   : > { %p30_p0 = scmp.ge.s32.totalorder %s29_s11, 2  ;;  %p219_p1 = scmp.ne.s32.totalorder %s2335_s26, %s2331_s25 }
   0x8   : > { %p220_p2 = scmp.eq.s32.totalorder %s1873_s9, 5  ;;  %p225_p5 = scmp.ne.s32.totalorder %s2331_s25, %s2327_s24 }
   0x9   : > { %s3167_s11 = smov (%p30_p0, %s29_s11), 0  ;;  %s3169_s12 = smov (!%p30_p0, %s32_s12), %s2351_s30 }
   0xa   : > { %3143 = sst [smem:[#allocation7_spill]] %s3167_s11  ;;  %s204_s13 = ssub.s32 %s2347_s29, %s3167_s11 }
   0xb   : > { %p2455_p3 = por %p220_p2, %p219_p1  ;;  %p34_p4 = scmp.ge.s32.totalorder %s3169_s12, 3 }
   0xc   : > { %p226_p6 = scmp.eq.s32.totalorder %s1874_s10, 5  ;;  %p1877_p7 = scmp.ge.s32.totalorder %s2355_s8, 1 }
   0xd   : > { %s3171_s12 = smov (%p34_p4, %s3169_s12), 0  ;;  %p292_p9 = scmp.lt.s32.totalorder %s2355_s8, 7 }
   0xe   : > { %3145 = sst [smem:[#allocation8_spill]] %s3171_s12  ;;  %p2464_p8 = por %p226_p6, %p225_p5 }
   0xf   : > { %s205_s16 = ssub.s32 %s2351_s30, %s3171_s12  ;;  %s209_s17 = sadd.s32 1, %s2335_s26 }
  0x10   : > { %s206_s18 = sor.u32 %s205_s16, %s204_s13  ;;  %p293_p10 = pnand %p1877_p7, %p292_p9 }
  0x11   : > { %p207_p11 = scmp.eq.s32.totalorder %s206_s18, 0  ;;  %p346_p12 = scmp.lt.s32.totalorder (!%p293_p10), %s2339_s27, 1 }
  0x12   : > { %296 = sbr.rel (%p293_p10) target bundleno = 2029 (0x7ed), region = 48  ;;  %p348_p13 = scmp.lt.s32.totalorder (!%p293_p10), %s2343_s28, 2 }
  0x13   : > { %s2473_s19 = scalar_select %p207_p11, %s2335_s26, %s209_s17  }
  0x14   : > { %s1885_s22 = sshll.u32 (!%p293_p10), %s2343_s28, 4  ;;  %s2359_s10 = smov (!%p293_p10), 16  }
  0x15   : > { %s1886_s17 = sadd.s32 (!%p293_p10), 4294967284, %s1885_s22  ;;  %s2360_s18 = smov (!%p293_p10), 32  }
  0x17   : > { %v404_v0 = vlaneseq  ;;  %vm373_vm0 = vcmask 126976   ;;  %v539_v1 = vld [vmem:[%s3136_s3 + $0x28] sm:$0xff]  ;;  %s347_s23 = scalar_select %p346_p12, %s2339_s27, 1  ;;  %v2357_v3 = vmov 0.0   ;;  %v538_v4 = vld [vmem:[%s3136_s3 + $0x20] sm:$0xff]  ;;  %v537_v8 = vld [vmem:[%s3136_s3 + $0x18] sm:$0xff]  ;;  %v411_v9 = vstv %s1886_s17 }
  0x18   : > { %374 = vst.msk [vmem:[#allocation2] sm:$0x1f] %vm373_vm0, %v2357_v3  ;;  %375 = vst.msk [vmem:[#allocation2 + $0x2d] sm:$0x1f] %vm373_vm0, %v2357_v3  ;;  %2022 = vmatprep.subr.mxu0 %v2357_v3  ;;  %2049 = vmatprep.subr.mxu1 %v2357_v3  ;;  %s349_s13 = scalar_select %p348_p13, %s2343_s28, 2  ;;  %vm462_vm3 = vcmask 130048  }
  0x19   : > { %v405_v2 = vshrl.u32 %v404_v0, 7  ;;  %2023 = vmatpush3.msra.mxu0 %v539_v1  ;;  %s2184_s16 = smul.u32 6, %s347_s23  ;;  %vm387_vm4 = vcmask 1043456   ;;  %v536_v29 = vld [vmem:[%s3136_s3 + $0x10] sm:$0xff]  ;;  %v535_v30 = vld [vmem:[%s3136_s3 + $0x8] sm:$0xff]  ;;  %v534_v38 = vld [vmem:[%s3136_s3] sm:$0xff] }
  0x1a   : > { %2024 = vmatprep.subr.mxu0 %v2357_v3  ;;  %s1879_s21 = sshll.u32 %s349_s13, 1  ;;  %s2185_s17 = smul.u32 6, %s2339_s27 }
  0x1b   : > { %v406_v5 = vadd.s32 8, %v405_v2  ;;  %v407_v6 = vadd.s32 16, %v405_v2  ;;  %v408_v7 = vadd.s32 24, %v405_v2  ;;  %v409_v10 = vadd.s32 32, %v405_v2  ;;  %2025 = vmatpush3.msra.mxu0 %v538_v4  ;;  %s352_s9 = sadd.s32 %s2184_s16, %s1879_s21 }
  0x1c   : > { %v412_v11 = vadd.s32 %v411_v9, %v405_v2  ;;  %2026 = vmatprep.subr.mxu0 %v2357_v3  ;;  %s1880_s23 = sshll.u32 %s352_s9, 3 }
  0x1d   : > { %v413_v12 = vadd.s32 %v411_v9, %v406_v5  ;;  %v414_v13 = vadd.s32 %v411_v9, %v407_v6  ;;  %v415_v14 = vadd.s32 %v411_v9, %v408_v7  ;;  %2027 = vmatpush3.msra.mxu0 %v537_v8  ;;  %s363_s12 = scalar_lea.vmem %s3134_s1, %s1880_s23  ;;  %s372_s13 = scalar_lea.vmem %s3135_s2, %s1880_s23  ;;  %v416_v18 = vadd.s32 %v411_v9, %v409_v10 }
  0x1e   : > { %vm417_vm1 = vcmp.ge.s32.totalorder %v412_v11, 0  ;;  %vm422_vm2 = vcmp.lt.s32.totalorder %v412_v11, 48  ;;  %2028 = vmatprep.subr.mxu0 %v2357_v3  ;;  %v2502_v15 = vld [vmem:[%s363_s12] sm:$0xff]  ;;  %v380_v16 = vld [vmem:[%s363_s12 + $0x8] sm:$0xf]  ;;  %s354_s20 = scalar_lea.vmem %s3133_s0, %s1880_s23 }
  0x1f   : > { %v383_v17 = vld [vmem:[%s372_s13] sm:$0xff]  ;;  %vm418_vm5 = vcmp.ge.s32.totalorder %v413_v12, 0  ;;  %vm423_vm6 = vcmp.lt.s32.totalorder %v413_v12, 48  ;;  %v384_v19 = vld [vmem:[%s372_s13 + $0x8] sm:$0xf]  ;;  %vm2507_vm7 = vmand %vm417_vm1, %vm422_vm2  ;;  %vm432_vm8 = vcmp.ge.f32.partialorder %v2502_v15, 0.0  ;;  %2029 = vmatpush3.msra.mxu0 %v536_v29 }
  0x20   : > { %v396_v20 = vrot.slane %v383_v17, 4  ;;  %v437_v22 = vmul.f32 0.1, %v2502_v15  ;;  %v397_v23 = vrot.slane %v384_v19, 4  ;;  %v382_v24 = vld [vmem:[%s354_s20 + $0x8] sm:$0xff]  ;;  %v381_v25 = vld [vmem:[%s354_s20] sm:$0xff]  ;;  %vm2524_vm13 = vmand %vm418_vm5, %vm423_vm6  ;;  %2030 = vmatprep.subr.mxu0 %v2357_v3 }
  0x21   : > { %vm419_vm9 = vcmp.ge.s32.totalorder %v414_v13, 0  ;;  %vm424_vm10 = vcmp.lt.s32.totalorder %v414_v13, 48  ;;  %vm420_vm11 = vcmp.ge.s32.totalorder %v415_v14, 0  ;;  %v389_v27 = vrot.slane %v382_v24, 4  ;;  %2031 = vmatpush3.msra.mxu0 %v535_v30  ;;  %v746_v29 = vld [vmem:[%s3138_s5 + $0x18] sm:$0xff]  ;;  %s1952_s20 = sshll.u32 %s2343_s28, 1 }
  0x22   : > { %v442_v26 = vsel %vm432_vm8, %v2502_v15, %v437_v22  ;;  %v388_v28 = vrot.slane %v381_v25, 4  ;;  %vm425_vm12 = vcmp.lt.s32.totalorder %v415_v14, 48  ;;  %v2529_v33 = vsel %vm387_vm4, %v396_v20, %v397_v23  ;;  %vm2540_vm0 = vmand %vm419_vm9, %vm424_vm10  ;;  %2032 = vmatprep.subr.mxu0 %v2357_v3  ;;  %v1887_v30 = vld [vmem:[%s3137_s4] ss:$0 sm:$0xff]  ;;  %s1743_s11 = sadd.s32 %s2185_s17, %s1952_s20  ;;  %s2361_s13 = smov [#allocation4]  }
  0x23   : > { %v457_v31 = vsel %vm2507_vm7, %v442_v26, 0.0  ;;  %vm421_vm14 = vcmp.ge.s32.totalorder %v416_v18, 0  ;;  %vm426_vm15 = vcmp.lt.s32.totalorder %v416_v18, 48  ;;  %v2545_v37 = vsel %vm387_vm4, %v389_v27, %v396_v20  ;;  %2033 = vmatpush3.msra.mxu0 %v534_v38  ;;  %s1953_s9 = sshll.u32 %s1743_s11, 7  ;;  %s2267_s16 = sshll.u32 %s2361_s13, 4  ;;  %s2268_s16 = int_to_ptr.vmem [resolvable:$false] %s2267_s16 }
  0x24   : > { %463 = vst.msk [vmem:[#allocation2 + $0x5] sm:$0xff] %vm462_vm3, %v457_v31  ;;  %v2533_v34 = vsel %vm387_vm4, %v380_v16, %v388_v28  ;;  %v2536_v35 = vsel %vm387_vm4, %v388_v28, %v389_v27  ;;  %vm436_vm1 = vcmp.ge.f32.partialorder %v2529_v33, 0.0  ;;  %vm2558_vm4 = vmand %vm420_vm11, %vm425_vm12  ;;  %vm435_vm6 = vcmp.ge.f32.partialorder %v2545_v37, 0.0  ;;  %2076 = vmatprep.subr.mxu0 %v2357_v3  ;;  %v748_v27 = vld [vmem:[%s3138_s5 + $0x28] sm:$0xff]  ;;  %v747_v28 = vld [vmem:[%s3138_s5 + $0x20] sm:$0xff]  ;;  %s3078_s23 = scalar_lea.hbm %s3140_s7, %s1953_s9  ;;  %s2269_s17 = scalar_lea.vmem %s2268_s16, 512 }
  0x25   : > { %vm433_vm2 = vcmp.ge.f32.partialorder %v2533_v34, 0.0  ;;  %v438_v39 = vmul.f32 0.1, %v2533_v34  ;;  %vm434_vm5 = vcmp.ge.f32.partialorder %v2536_v35, 0.0  ;;  %v439_v40 = vmul.f32 0.1, %v2536_v35  ;;  %vm2566_vm8 = vmand %vm421_vm14, %vm426_vm15  ;;  %2050 = vmatpush3.msra.mxu1 %v748_v27 }
  0x26   : > { %v440_v42 = vmul.f32 0.1, %v2545_v37  ;;  %v441_v44 = vmul.f32 0.1, %v2529_v33  ;;  %vm2358_vm9 = vmmov 0   ;;  %vm528_vm10 = vcmask 261120   ;;  %2051 = vmatprep.subr.mxu1 %v2357_v3 }
  0x27   : > { %v443_v45 = vsel %vm433_vm2, %v2533_v34, %v438_v39  ;;  %v444_v46 = vsel %vm434_vm5, %v2536_v35, %v439_v40  ;;  %2034 = vmatprep.mubr.msk.f32.mxu0 %vm2358_vm9, %v2357_v3  ;;  %2061 = vmatprep.mubr.msk.f32.mxu1 %vm2358_vm9, %v2357_v3  ;;  %vm547_vm11 = vcmask 392192   ;;  %vm376_vm12 = vcmask 122880   ;;  %v745_v40 = vld [vmem:[%s3138_s5 + $0x10] sm:$0xff] }
  0x28   : > { %v458_v47 = vsel %vm2524_vm13, %v443_v45, 0.0  ;;  %v459_v48 = vsel %vm2540_vm0, %v444_v46, 0.0  ;;  %v445_v49 = vsel %vm435_vm6, %v2545_v37, %v440_v42  ;;  %v446_v50 = vsel %vm436_vm1, %v2529_v33, %v441_v44  ;;  %377 = vst.msk [vmem:[#allocation3] sm:$0x1] %vm376_vm12, %v2357_v3  ;;  %378 = vst.msk [vmem:[#allocation3 + $0x29] sm:$0x1] %vm376_vm12, %v2357_v3  ;;  %2052 = vmatpush3.msra.mxu1 %v747_v28 }
  0x29   : > { %464 = vst.msk [vmem:[#allocation2 + $0xd] sm:$0xff] %vm462_vm3, %v458_v47  ;;  %465 = vst.msk [vmem:[#allocation2 + $0x15] sm:$0xff] %vm462_vm3, %v459_v48  ;;  %v460_v51 = vsel %vm2558_vm4, %v445_v49, 0.0  ;;  %v461_v52 = vsel %vm2566_vm8, %v446_v50, 0.0  ;;  %2053 = vmatprep.subr.mxu1 %v2357_v3  ;;  %v744_v42 = vld [vmem:[%s3138_s5 + $0x8] sm:$0xff]  ;;  %v743_v50 = vld [vmem:[%s3138_s5] sm:$0xff] }
  0x2a   : > { %466 = vst.msk [vmem:[#allocation2 + $0x1d] sm:$0xff] %vm462_vm3, %v460_v51  ;;  %467 = vst.msk [vmem:[#allocation2 + $0x25] sm:$0xff] %vm462_vm3, %v461_v52  ;;  %2054 = vmatpush3.msra.mxu1 %v746_v29 }
  0x2b   : > { %v473_v53 = vld [vmem:[#allocation2 + $0x5] sm:$0xff]  ;;  %2055 = vmatprep.subr.mxu1 %v2357_v3 }
  0x2c   : > { %488 = vrot.lane.b32.xlu0 %v473_v53, %s2359_s10  ;;  %v468_v0 = vld [vmem:[#allocation2 + $0x4] sm:$0xff]  ;;  %2056 = vmatpush3.msra.mxu1 %v745_v40 }
  0x2d   : > { %2057 = vmatprep.subr.mxu1 %v2357_v3 }
  0x2e   : > { %2058 = vmatpush3.msra.mxu1 %v744_v42 }
  0x2f   : > { %2059 = vmatprep.subr.mxu1 %v2357_v3 }
  0x30   : > { %v474_v54 = vld [vmem:[#allocation2 + $0xd] sm:$0xff]  ;;  %v475_v57 = vld [vmem:[#allocation2 + $0x15] sm:$0xff]  ;;  %2060 = vmatpush3.msra.mxu1 %v743_v50 }
  0x31   : > { %v478_v55 = vld [vmem:[#allocation2 + $0x6] sm:$0xff]  ;;  %490 = vrot.lane.b32.xlu1 %v474_v54, %s2359_s10  ;;  %v479_v56 = vld [vmem:[#allocation2 + $0xe] sm:$0xff]  ;;  %v480_v58 = vld [vmem:[#allocation2 + $0x16] sm:$0xff]  ;;  %2103 = vmatprep.subr.mxu1 %v2357_v3 }
  0x32   : > { %508 = vrot.lane.b32.xlu0 %v478_v55, %s2360_s18  ;;  %v476_v59 = vld [vmem:[#allocation2 + $0x1d] sm:$0xff]  ;;  %v477_v61 = vld [vmem:[#allocation2 + $0x25] sm:$0xff]  ;;  %v470_v7 = vld [vmem:[#allocation2 + $0x14] sm:$0xff] }
  0x33   : > { %v481_v60 = vld [vmem:[#allocation2 + $0x1e] sm:$0xff]  ;;  %v482_v62 = vld [vmem:[#allocation2 + $0x26] sm:$0xff] }
  0x34   : > { %v469_v5 = vld [vmem:[#allocation2 + $0xc] sm:$0xff]  ;;  %v471_v13 = vld [vmem:[#allocation2 + $0x1c] sm:$0xff]  ;;  %v472_v19 = vld [vmem:[#allocation2 + $0x24] sm:$0xff] }
  0x35   : > { %510 = vrot.lane.b32.xlu1 %v479_v56, %s2360_s18 }
  0x36   : > { %492 = vrot.lane.b32.xlu0 %v475_v57, %s2359_s10 }
  0x39   : > { %512 = vrot.lane.b32.xlu1 %v480_v58, %s2360_s18 }
  0x3a   : > { %494 = vrot.lane.b32.xlu0 %v476_v59, %s2359_s10 }
  0x3d   : > { %514 = vrot.lane.b32.xlu1 %v481_v60, %s2360_s18 }
  0x3e   : > { %496 = vrot.lane.b32.xlu0 %v477_v61, %s2359_s10 }
  0x41   : > { %516 = vrot.lane.b32.xlu1 %v482_v62, %s2360_s18 }
  0x9e   : > { %v489_v63 = vpop.permute.xlu0 %488 }
  0x9f   : > { %v523_v1 = vsel %vm462_vm3, %v468_v0, %v489_v63 }
  0xa3   : > { %v491_v2 = vpop.permute.xlu1 %490 }
  0xa4   : > { %v509_v4 = vpop.permute.xlu0 %508  ;;  %v524_v8 = vsel %vm462_vm3, %v469_v5, %v491_v2 }
  0xa5   : > { %v529_v6 = vsel %vm528_vm10, %v523_v1, %v509_v4 }
  0xa6   : > { %2035 = vmatmul.mubr.msk.f32.vlgmr.msra.gmra.mxu0 %vm547_vm11, %v529_v6 }
  0xa7   : > { %2037 = vmatprep.mubr.msk.f32.mxu0 %vm2358_vm9, %v2357_v3  ;;  %v511_v9 = vpop.permute.xlu1 %510 }
  0xa8   : > { %v493_v10 = vpop.permute.xlu0 %492  ;;  %v530_v11 = vsel %vm528_vm10, %v524_v8, %v511_v9 }
  0xa9   : > { %v525_v12 = vsel %vm462_vm3, %v470_v7, %v493_v10 }
  0xaa   : > { %2038 = vmatmul.mubr.msk.f32.gmra.mxu0 %vm547_vm11, %v530_v11 }
  0xab   : > { %2040 = vmatprep.mubr.msk.f32.mxu0 %vm2358_vm9, %v2357_v3  ;;  %v513_v14 = vpop.permute.xlu1 %512 }
  0xac   : > { %v495_v16 = vpop.permute.xlu0 %494  ;;  %v531_v17 = vsel %vm528_vm10, %v525_v12, %v513_v14 }
  0xad   : > { %v526_v18 = vsel %vm462_vm3, %v471_v13, %v495_v16 }
  0xae   : > { %2041 = vmatmul.mubr.msk.f32.gmra.mxu0 %vm547_vm11, %v531_v17 }
  0xaf   : > { %2043 = vmatprep.mubr.msk.f32.mxu0 %vm2358_vm9, %v2357_v3  ;;  %v515_v20 = vpop.permute.xlu1 %514 }
  0xb0   : > { %v497_v22 = vpop.permute.xlu0 %496  ;;  %v532_v23 = vsel %vm528_vm10, %v526_v18, %v515_v20 }
  0xb1   : > { %v527_v24 = vsel %vm462_vm3, %v472_v19, %v497_v22 }
  0xb2   : > { %2044 = vmatmul.mubr.msk.f32.gmra.mxu0 %vm547_vm11, %v532_v23 }
  0xb3   : > { %2046 = vmatprep.mubr.msk.f32.mxu0 %vm2358_vm9, %v2357_v3  ;;  %v517_v25 = vpop.permute.xlu1 %516 }
  0xb4   : > { %v533_v26 = vsel %vm528_vm10, %v527_v24, %v517_v25 }
  0xb6   : > { %2047 = vmatmul.mubr.msk.f32.gmra.mxu0 %vm547_vm11, %v533_v26 }
  0xb7   : > { %2088 = vmatprep.mubr.msk.f32.mxu0 %vm2358_vm9, %v2357_v3 }
 0x166   : > { %v629_v31 = vpop.f32.mrf.mxu0 }
 0x167   : > { %v630_v38 = vadd.f32 %v1887_v30, %v629_v31 }
 0x168   : > { %v2036_v39 = vpop.f32.mrf.mxu0 }
 0x169   : > { %vm653_vm14 = vcmp.ge.f32.partialorder %v630_v38, 0.0  ;;  %v658_v44 = vmul.f32 0.1, %v630_v38 }
 0x16a   : > { %v634_v45 = vpop.f32.mrf.mxu0 }
 0x16b   : > { %v663_v46 = vsel %vm653_vm14, %v630_v38, %v658_v44  ;;  %v635_v47 = vadd.f32 %v1887_v30, %v634_v45 }
 0x16c   : > { %v668_v48 = vsel %vm2507_vm7, %v663_v46, 0.0  ;;  %v2039_v49 = vpop.f32.mrf.mxu0 }
 0x16d   : > { %673 = vst.msk [vmem:[#allocation3 + $0x1] sm:$0xff] %vm462_vm3, %v668_v48  ;;  %vm654_vm15 = vcmp.ge.f32.partialorder %v635_v47, 0.0  ;;  %v659_v51 = vmul.f32 0.1, %v635_v47 }
 0x16e   : > { %v639_v52 = vpop.f32.mrf.mxu0 }
 0x16f   : > { %v664_v53 = vsel %vm654_vm15, %v635_v47, %v659_v51  ;;  %v640_v54 = vadd.f32 %v1887_v30, %v639_v52 }
 0x170   : > { %v669_v55 = vsel %vm2524_vm13, %v664_v53, 0.0  ;;  %v2042_v56 = vpop.f32.mrf.mxu0 }
 0x171   : > { %674 = vst.msk [vmem:[#allocation3 + $0x9] sm:$0xff] %vm462_vm3, %v669_v55  ;;  %vm655_vm1 = vcmp.ge.f32.partialorder %v640_v54, 0.0  ;;  %v660_v57 = vmul.f32 0.1, %v640_v54  ;;  %v1903_v55 = vld [vmem:[%s3136_s3 + $0x50] sm:$0xff]  ;;  %v1902_v56 = vld [vmem:[%s3136_s3 + $0x48] sm:$0xff] }
 0x172   : > { %v644_v58 = vpop.f32.mrf.mxu0 }
 0x173   : > { %v665_v59 = vsel %vm655_vm1, %v640_v54, %v660_v57  ;;  %v645_v60 = vadd.f32 %v1887_v30, %v644_v58  ;;  %v1904_v54 = vld [vmem:[%s3136_s3 + $0x58] sm:$0xff]  ;;  %v1901_v57 = vld [vmem:[%s3136_s3 + $0x40] sm:$0xff] }
 0x174   : > { %v670_v61 = vsel %vm2540_vm0, %v665_v59, 0.0  ;;  %v2045_v62 = vpop.f32.mrf.mxu0  ;;  %v683_v63 = vld [vmem:[#allocation3 + $0x1] sm:$0xff]  ;;  %2077 = vmatpush3.msra.mxu0 %v1904_v54 }
 0x175   : > { %675 = vst.msk [vmem:[#allocation3 + $0x11] sm:$0xff] %vm462_vm3, %v670_v61  ;;  %vm656_vm2 = vcmp.ge.f32.partialorder %v645_v60, 0.0  ;;  %v661_v0 = vmul.f32 0.1, %v645_v60  ;;  %698 = vrot.lane.b32.xlu0 %v683_v63, %s2359_s10  ;;  %v678_v22 = vld [vmem:[#allocation3] sm:$0xff]  ;;  %2078 = vmatprep.subr.mxu0 %v2357_v3 }
 0x176   : > { %v649_v1 = vpop.f32.mrf.mxu0  ;;  %2079 = vmatpush3.msra.mxu0 %v1903_v55  ;;  %v1900_v58 = vld [vmem:[%s3136_s3 + $0x38] sm:$0xff] }
 0x177   : > { %v666_v2 = vsel %vm656_vm2, %v645_v60, %v661_v0  ;;  %v650_v4 = vadd.f32 %v1887_v30, %v649_v1  ;;  %2080 = vmatprep.subr.mxu0 %v2357_v3  ;;  %v1898_v60 = vld [vmem:[%s3139_s6] ss:$0 sm:$0xff]  ;;  %v1899_v1 = vld [vmem:[%s3136_s3 + $0x30] sm:$0xff] }
 0x178   : > { %v671_v5 = vsel %vm2558_vm4, %v666_v2, 0.0  ;;  %v2048_v6 = vpop.f32.mrf.mxu0  ;;  %v688_v7 = vld [vmem:[#allocation3 + $0x2] sm:$0xff]  ;;  %2081 = vmatpush3.msra.mxu0 %v1902_v56 }
 0x179   : > { %v684_v8 = vld [vmem:[#allocation3 + $0x9] sm:$0xff]  ;;  %676 = vst.msk [vmem:[#allocation3 + $0x19] sm:$0xff] %vm462_vm3, %v671_v5  ;;  %vm657_vm5 = vcmp.ge.f32.partialorder %v650_v4, 0.0  ;;  %v662_v9 = vmul.f32 0.1, %v650_v4  ;;  %718 = vrot.lane.b32.xlu1 %v688_v7, %s2360_s18  ;;  %2082 = vmatprep.subr.mxu0 %v2357_v3 }
 0x17a   : > { %700 = vrot.lane.b32.xlu0 %v684_v8, %s2359_s10  ;;  %v679_v27 = vld [vmem:[#allocation3 + $0x8] sm:$0xff]  ;;  %2083 = vmatpush3.msra.mxu0 %v1901_v57 }
 0x17b   : > { %v667_v10 = vsel %vm657_vm5, %v650_v4, %v662_v9  ;;  %2084 = vmatprep.subr.mxu0 %v2357_v3 }
 0x17c   : > { %v672_v11 = vsel %vm2566_vm8, %v667_v10, 0.0  ;;  %v689_v12 = vld [vmem:[#allocation3 + $0xa] sm:$0xff]  ;;  %2085 = vmatpush3.msra.mxu0 %v1900_v58 }
 0x17d   : > { %v685_v13 = vld [vmem:[#allocation3 + $0x11] sm:$0xff]  ;;  %677 = vst.msk [vmem:[#allocation3 + $0x21] sm:$0xff] %vm462_vm3, %v672_v11  ;;  %720 = vrot.lane.b32.xlu1 %v689_v12, %s2360_s18  ;;  %2086 = vmatprep.subr.mxu0 %v2357_v3 }
 0x17e   : > { %702 = vrot.lane.b32.xlu0 %v685_v13, %s2359_s10  ;;  %v680_v38 = vld [vmem:[#allocation3 + $0x10] sm:$0xff]  ;;  %2087 = vmatpush3.msra.mxu0 %v1899_v1 }
 0x17f   : > { %2130 = vmatprep.subr.mxu0 %v2357_v3 }
 0x180   : > { %v690_v14 = vld [vmem:[#allocation3 + $0x12] sm:$0xff] }
 0x181   : > { %v686_v16 = vld [vmem:[#allocation3 + $0x19] sm:$0xff]  ;;  %722 = vrot.lane.b32.xlu1 %v690_v14, %s2360_s18 }
 0x182   : > { %704 = vrot.lane.b32.xlu0 %v686_v16, %s2359_s10  ;;  %v681_v45 = vld [vmem:[#allocation3 + $0x18] sm:$0xff] }
 0x184   : > { %v691_v17 = vld [vmem:[#allocation3 + $0x1a] sm:$0xff]  ;;  %v692_v19 = vld [vmem:[#allocation3 + $0x22] sm:$0xff] }
 0x185   : > { %v687_v18 = vld [vmem:[#allocation3 + $0x21] sm:$0xff]  ;;  %724 = vrot.lane.b32.xlu1 %v691_v17, %s2360_s18 }
 0x186   : > { %706 = vrot.lane.b32.xlu0 %v687_v18, %s2359_s10  ;;  %v682_v50 = vld [vmem:[#allocation3 + $0x20] sm:$0xff] }
 0x189   : > { %726 = vrot.lane.b32.xlu1 %v692_v19, %s2360_s18 }
 0x1e7   : > { %v699_v20 = vpop.permute.xlu0 %698 }
 0x1e8   : > { %v733_v23 = vsel %vm462_vm3, %v678_v22, %v699_v20 }
 0x1eb   : > { %v719_v24 = vpop.permute.xlu1 %718 }
 0x1ec   : > { %v701_v25 = vpop.permute.xlu0 %700  ;;  %v738_v26 = vsel %vm528_vm10, %v733_v23, %v719_v24 }
 0x1ed   : > { %2062 = vmatmul.mubr.msk.f32.vlgmr.msra.gmra.mxu1 %vm547_vm11, %v738_v26  ;;  %v734_v28 = vsel %vm462_vm3, %v679_v27, %v701_v25 }
 0x1ee   : > { %2064 = vmatprep.mubr.msk.f32.mxu1 %vm2358_vm9, %v2357_v3 }
 0x1ef   : > { %v721_v29 = vpop.permute.xlu1 %720 }
 0x1f0   : > { %v703_v30 = vpop.permute.xlu0 %702  ;;  %v739_v31 = vsel %vm528_vm10, %v734_v28, %v721_v29 }
 0x1f1   : > { %2065 = vmatmul.mubr.msk.f32.gmra.mxu1 %vm547_vm11, %v739_v31  ;;  %v735_v39 = vsel %vm462_vm3, %v680_v38, %v703_v30 }
 0x1f2   : > { %2067 = vmatprep.mubr.msk.f32.mxu1 %vm2358_vm9, %v2357_v3 }
 0x1f3   : > { %v723_v40 = vpop.permute.xlu1 %722 }
 0x1f4   : > { %v705_v42 = vpop.permute.xlu0 %704  ;;  %v740_v44 = vsel %vm528_vm10, %v735_v39, %v723_v40 }
 0x1f5   : > { %2068 = vmatmul.mubr.msk.f32.gmra.mxu1 %vm547_vm11, %v740_v44  ;;  %v736_v46 = vsel %vm462_vm3, %v681_v45, %v705_v42 }
 0x1f6   : > { %2070 = vmatprep.mubr.msk.f32.mxu1 %vm2358_vm9, %v2357_v3 }
 0x1f7   : > { %v725_v47 = vpop.permute.xlu1 %724 }
 0x1f8   : > { %v741_v48 = vsel %vm528_vm10, %v736_v46, %v725_v47  ;;  %v707_v49 = vpop.permute.xlu0 %706 }
 0x1f9   : > { %2071 = vmatmul.mubr.msk.f32.gmra.mxu1 %vm547_vm11, %v741_v48  ;;  %v737_v51 = vsel %vm462_vm3, %v682_v50, %v707_v49 }
 0x1fa   : > { %2073 = vmatprep.mubr.msk.f32.mxu1 %vm2358_vm9, %v2357_v3 }
 0x1fb   : > { %v727_v52 = vpop.permute.xlu1 %726 }
 0x1fc   : > { %v742_v53 = vsel %vm528_vm10, %v737_v51, %v727_v52 }
 0x1fd   : > { %2074 = vmatmul.mubr.msk.f32.gmra.mxu1 %vm547_vm11, %v742_v53 }
 0x1fe   : > { %2115 = vmatprep.mubr.msk.f32.mxu1 %vm2358_vm9, %v2357_v3 }
 0x2ad   : > { %v830_v59 = vpop.f32.mrf.mxu1 }
 0x2ae   : > { %v854_v61 = vadd.f32 %v830_v59, %v2502_v15 }
 0x2af   : > { %v2063_v62 = vpop.f32.mrf.mxu1 }
 0x2b0   : > { %v2733_v63 = vadd.f32 %v1898_v60, %v854_v61 }
 0x2b1   : > { %v835_v0 = vpop.f32.mrf.mxu1 }
 0x2b2   : > { %vm871_vm6 = vcmp.ge.f32.partialorder %v2733_v63, 0.0  ;;  %v876_v2 = vmul.f32 0.1, %v2733_v63  ;;  %v855_v4 = vadd.f32 %v835_v0, %v2533_v34 }
 0x2b3   : > { %v2066_v5 = vpop.f32.mrf.mxu1 }
 0x2b4   : > { %v881_v15 = vsel %vm871_vm6, %v2733_v63, %v876_v2  ;;  %v2743_v6 = vadd.f32 %v1898_v60, %v855_v4 }
 0x2b5   : > { %v886_v7 = vsel %vm2507_vm7, %v881_v15, 0.0  ;;  %v840_v8 = vpop.f32.mrf.mxu1 }
 0x2b6   : > { %891 = vst.msk [vmem:[#allocation2 + $0x5] sm:$0xff] %vm462_vm3, %v886_v7  ;;  %vm872_vm12 = vcmp.ge.f32.partialorder %v2743_v6, 0.0  ;;  %v877_v9 = vmul.f32 0.1, %v2743_v6  ;;  %v856_v34 = vadd.f32 %v840_v8, %v2536_v35 }
 0x2b7   : > { %v2069_v10 = vpop.f32.mrf.mxu1 }
 0x2b8   : > { %v882_v11 = vsel %vm872_vm12, %v2743_v6, %v877_v9  ;;  %v2752_v12 = vadd.f32 %v1898_v60, %v856_v34  ;;  %v1917_v10 = vld [vmem:[%s3138_s5 + $0x58] sm:$0xff] }
 0x2b9   : > { %v887_v13 = vsel %vm2524_vm13, %v882_v11, 0.0  ;;  %v845_v14 = vpop.f32.mrf.mxu1  ;;  %v1916_v11 = vld [vmem:[%s3138_s5 + $0x50] sm:$0xff]  ;;  %2104 = vmatpush3.msra.mxu1 %v1917_v10 }
 0x2ba   : > { %892 = vst.msk [vmem:[#allocation2 + $0xd] sm:$0xff] %vm462_vm3, %v887_v13  ;;  %vm873_vm14 = vcmp.ge.f32.partialorder %v2752_v12, 0.0  ;;  %v878_v16 = vmul.f32 0.1, %v2752_v12  ;;  %v857_v17 = vadd.f32 %v845_v14, %v2545_v37  ;;  %2105 = vmatprep.subr.mxu1 %v2357_v3  ;;  %v1915_v13 = vld [vmem:[%s3138_s5 + $0x48] sm:$0xff]  ;;  %v1914_v14 = vld [vmem:[%s3138_s5 + $0x40] sm:$0xff] }
 0x2bb   : > { %v2072_v18 = vpop.f32.mrf.mxu1  ;;  %2106 = vmatpush3.msra.mxu1 %v1916_v11 }
 0x2bc   : > { %v883_v35 = vsel %vm873_vm14, %v2752_v12, %v878_v16  ;;  %v2761_v19 = vadd.f32 %v1898_v60, %v857_v17  ;;  %2107 = vmatprep.subr.mxu1 %v2357_v3  ;;  %v1913_v16 = vld [vmem:[%s3138_s5 + $0x38] sm:$0xff]  ;;  %v1906_v17 = vld [vmem:[%s3137_s4 + $0x1] ss:$0 sm:$0xff] }
 0x2bd   : > { %v888_v20 = vsel %vm2540_vm0, %v883_v35, 0.0  ;;  %v850_v22 = vpop.f32.mrf.mxu1  ;;  %v901_v23 = vld [vmem:[#allocation2 + $0x5] sm:$0xff]  ;;  %2108 = vmatpush3.msra.mxu1 %v1915_v13 }
 0x2be   : > { %893 = vst.msk [vmem:[#allocation2 + $0x15] sm:$0xff] %vm462_vm3, %v888_v20  ;;  %vm874_vm15 = vcmp.ge.f32.partialorder %v2761_v19, 0.0  ;;  %v879_v24 = vmul.f32 0.1, %v2761_v19  ;;  %v858_v25 = vadd.f32 %v850_v22, %v2529_v33  ;;  %916 = vrot.lane.b32.xlu0 %v901_v23, %s2359_s10  ;;  %v896_v49 = vld [vmem:[#allocation2 + $0x2] sm:$0xff]  ;;  %2109 = vmatprep.subr.mxu1 %v2357_v3  ;;  %v1912_v22 = vld [vmem:[%s3138_s5 + $0x30] sm:$0xff] }
 0x2bf   : > { %v2075_v37 = vpop.f32.mrf.mxu1  ;;  %2110 = vmatpush3.msra.mxu1 %v1914_v14 }
 0x2c0   : > { %v884_v26 = vsel %vm874_vm15, %v2761_v19, %v879_v24  ;;  %v2771_v27 = vadd.f32 %v1898_v60, %v858_v25  ;;  %2111 = vmatprep.subr.mxu1 %v2357_v3 }
 0x2c1   : > { %v889_v28 = vsel %vm2558_vm4, %v884_v26, 0.0  ;;  %v906_v29 = vld [vmem:[#allocation2 + $0x8] sm:$0xff]  ;;  %2112 = vmatpush3.msra.mxu1 %v1913_v16 }
 0x2c2   : > { %v902_v30 = vld [vmem:[#allocation2 + $0xd] sm:$0xff]  ;;  %894 = vst.msk [vmem:[#allocation2 + $0x1d] sm:$0xff] %vm462_vm3, %v889_v28  ;;  %vm875_vm1 = vcmp.ge.f32.partialorder %v2771_v27, 0.0  ;;  %v880_v31 = vmul.f32 0.1, %v2771_v27  ;;  %936 = vrot.lane.b32.xlu1 %v906_v29, %s2360_s18  ;;  %2113 = vmatprep.subr.mxu1 %v2357_v3 }
 0x2c3   : > { %918 = vrot.lane.b32.xlu0 %v902_v30, %s2359_s10  ;;  %v897_v54 = vld [vmem:[#allocation2 + $0xa] sm:$0xff]  ;;  %2114 = vmatpush3.msra.mxu1 %v1912_v22 }
 0x2c4   : > { %v885_v33 = vsel %vm875_vm1, %v2771_v27, %v880_v31  ;;  %2157 = vmatprep.subr.mxu1 %v2357_v3 }
 0x2c5   : > { %v890_v38 = vsel %vm2566_vm8, %v885_v33, 0.0  ;;  %v907_v39 = vld [vmem:[#allocation2 + $0x10] sm:$0xff] }
 0x2c6   : > { %v903_v40 = vld [vmem:[#allocation2 + $0x15] sm:$0xff]  ;;  %895 = vst.msk [vmem:[#allocation2 + $0x25] sm:$0xff] %vm462_vm3, %v890_v38  ;;  %938 = vrot.lane.b32.xlu1 %v907_v39, %s2360_s18 }
 0x2c7   : > { %920 = vrot.lane.b32.xlu0 %v903_v40, %s2359_s10  ;;  %v898_v59 = vld [vmem:[#allocation2 + $0x12] sm:$0xff] }
 0x2c9   : > { %v908_v42 = vld [vmem:[#allocation2 + $0x18] sm:$0xff] }
 0x2ca   : > { %v904_v44 = vld [vmem:[#allocation2 + $0x1d] sm:$0xff]  ;;  %940 = vrot.lane.b32.xlu1 %v908_v42, %s2360_s18 }
 0x2cb   : > { %922 = vrot.lane.b32.xlu0 %v904_v44, %s2359_s10  ;;  %v899_v1 = vld [vmem:[#allocation2 + $0x1a] sm:$0xff] }
 0x2cd   : > { %v909_v45 = vld [vmem:[#allocation2 + $0x20] sm:$0xff]  ;;  %v910_v47 = vld [vmem:[#allocation2 + $0x28] sm:$0xff] }
 0x2ce   : > { %v905_v46 = vld [vmem:[#allocation2 + $0x25] sm:$0xff]  ;;  %942 = vrot.lane.b32.xlu1 %v909_v45, %s2360_s18 }
 0x2cf   : > { %924 = vrot.lane.b32.xlu0 %v905_v46, %s2359_s10  ;;  %v900_v7 = vld [vmem:[#allocation2 + $0x22] sm:$0xff] }
 0x2d2   : > { %944 = vrot.lane.b32.xlu1 %v910_v47, %s2360_s18 }
 0x330   : > { %v917_v48 = vpop.permute.xlu0 %916 }
 0x331   : > { %v951_v50 = vsel %vm462_vm3, %v896_v49, %v917_v48 }
 0x334   : > { %v937_v51 = vpop.permute.xlu1 %936 }
 0x335   : > { %v919_v52 = vpop.permute.xlu0 %918  ;;  %v956_v53 = vsel %vm528_vm10, %v951_v50, %v937_v51 }
 0x336   : > { %2089 = vmatmul.mubr.msk.f32.vlgmr.msra.gmra.mxu0 %vm547_vm11, %v956_v53  ;;  %v952_v55 = vsel %vm462_vm3, %v897_v54, %v919_v52 }
 0x337   : > { %2091 = vmatprep.mubr.msk.f32.mxu0 %vm2358_vm9, %v2357_v3 }
 0x338   : > { %v939_v56 = vpop.permute.xlu1 %938 }
 0x339   : > { %v921_v57 = vpop.permute.xlu0 %920  ;;  %v957_v58 = vsel %vm528_vm10, %v952_v55, %v939_v56 }
 0x33a   : > { %2092 = vmatmul.mubr.msk.f32.gmra.mxu0 %vm547_vm11, %v957_v58  ;;  %v953_v60 = vsel %vm462_vm3, %v898_v59, %v921_v57 }
 0x33b   : > { %2094 = vmatprep.mubr.msk.f32.mxu0 %vm2358_vm9, %v2357_v3 }
 0x33c   : > { %v941_v61 = vpop.permute.xlu1 %940 }
 0x33d   : > { %v923_v62 = vpop.permute.xlu0 %922  ;;  %v958_v0 = vsel %vm528_vm10, %v953_v60, %v941_v61 }
 0x33e   : > { %2095 = vmatmul.mubr.msk.f32.gmra.mxu0 %vm547_vm11, %v958_v0  ;;  %v954_v2 = vsel %vm462_vm3, %v899_v1, %v923_v62 }
 0x33f   : > { %2097 = vmatprep.mubr.msk.f32.mxu0 %vm2358_vm9, %v2357_v3 }
 0x340   : > { %v943_v4 = vpop.permute.xlu1 %942 }
 0x341   : > { %v959_v5 = vsel %vm528_vm10, %v954_v2, %v943_v4  ;;  %v925_v15 = vpop.permute.xlu0 %924 }
 0x342   : > { %2098 = vmatmul.mubr.msk.f32.gmra.mxu0 %vm547_vm11, %v959_v5  ;;  %v955_v8 = vsel %vm462_vm3, %v900_v7, %v925_v15 }
 0x343   : > { %2100 = vmatprep.mubr.msk.f32.mxu0 %vm2358_vm9, %v2357_v3 }
 0x344   : > { %v945_v9 = vpop.permute.xlu1 %944 }
 0x345   : > { %v960_v34 = vsel %vm528_vm10, %v955_v8, %v945_v9 }
 0x346   : > { %2101 = vmatmul.mubr.msk.f32.gmra.mxu0 %vm547_vm11, %v960_v34 }
 0x347   : > { %2142 = vmatprep.mubr.msk.f32.mxu0 %vm2358_vm9, %v2357_v3 }
 0x3f6   : > { %v1057_v18 = vpop.f32.mrf.mxu0 }
 0x3f7   : > { %v1058_v35 = vadd.f32 %v1906_v17, %v1057_v18 }
 0x3f8   : > { %v2090_v20 = vpop.f32.mrf.mxu0 }
 0x3f9   : > { %vm1081_vm2 = vcmp.ge.f32.partialorder %v1058_v35, 0.0  ;;  %v1086_v23 = vmul.f32 0.1, %v1058_v35 }
 0x3fa   : > { %v1062_v24 = vpop.f32.mrf.mxu0 }
 0x3fb   : > { %v1091_v25 = vsel %vm1081_vm2, %v1058_v35, %v1086_v23  ;;  %v1063_v37 = vadd.f32 %v1906_v17, %v1062_v24 }
 0x3fc   : > { %v1096_v26 = vsel %vm2507_vm7, %v1091_v25, 0.0  ;;  %v2093_v28 = vpop.f32.mrf.mxu0 }
 0x3fd   : > { %1101 = vst.msk [vmem:[#allocation3 + $0x1] sm:$0xff] %vm462_vm3, %v1096_v26  ;;  %vm1082_vm5 = vcmp.ge.f32.partialorder %v1063_v37, 0.0  ;;  %v1087_v29 = vmul.f32 0.1, %v1063_v37 }
 0x3fe   : > { %v1067_v30 = vpop.f32.mrf.mxu0 }
 0x3ff   : > { %v1092_v31 = vsel %vm1082_vm5, %v1063_v37, %v1087_v29  ;;  %v1068_v33 = vadd.f32 %v1906_v17, %v1067_v30 }
 0x400   : > { %v1097_v38 = vsel %vm2524_vm13, %v1092_v31, 0.0  ;;  %v2096_v39 = vpop.f32.mrf.mxu0 }
 0x401   : > { %1102 = vst.msk [vmem:[#allocation3 + $0x9] sm:$0xff] %vm462_vm3, %v1097_v38  ;;  %vm1083_vm6 = vcmp.ge.f32.partialorder %v1068_v33, 0.0  ;;  %v1088_v40 = vmul.f32 0.1, %v1068_v33  ;;  %v1929_v38 = vld [vmem:[%s3136_s3 + $0x80] sm:$0xff]  ;;  %v1928_v39 = vld [vmem:[%s3136_s3 + $0x78] sm:$0xff] }
 0x402   : > { %v1072_v42 = vpop.f32.mrf.mxu0 }
 0x403   : > { %v1093_v44 = vsel %vm1083_vm6, %v1068_v33, %v1088_v40  ;;  %v1073_v45 = vadd.f32 %v1906_v17, %v1072_v42  ;;  %v1930_v33 = vld [vmem:[%s3136_s3 + $0x88] sm:$0xff]  ;;  %v1927_v40 = vld [vmem:[%s3136_s3 + $0x70] sm:$0xff] }
 0x404   : > { %v1098_v46 = vsel %vm2540_vm0, %v1093_v44, 0.0  ;;  %v2099_v47 = vpop.f32.mrf.mxu0  ;;  %v1111_v48 = vld [vmem:[#allocation3 + $0x1] sm:$0xff]  ;;  %2131 = vmatpush3.msra.mxu0 %v1930_v33  ;;  %v1926_v42 = vld [vmem:[%s3136_s3 + $0x68] sm:$0xff] }
 0x405   : > { %1103 = vst.msk [vmem:[#allocation3 + $0x11] sm:$0xff] %vm462_vm3, %v1098_v46  ;;  %vm1084_vm12 = vcmp.ge.f32.partialorder %v1073_v45, 0.0  ;;  %v1089_v49 = vmul.f32 0.1, %v1073_v45  ;;  %1126 = vrot.lane.b32.xlu0 %v1111_v48, %s2359_s10  ;;  %v1106_v15 = vld [vmem:[#allocation3] sm:$0xff]  ;;  %2132 = vmatprep.subr.mxu0 %v2357_v3 }
 0x406   : > { %v1077_v50 = vpop.f32.mrf.mxu0  ;;  %2133 = vmatpush3.msra.mxu0 %v1929_v38 }
 0x407   : > { %v1094_v51 = vsel %vm1084_vm12, %v1073_v45, %v1089_v49  ;;  %v1078_v52 = vadd.f32 %v1906_v17, %v1077_v50  ;;  %2134 = vmatprep.subr.mxu0 %v2357_v3  ;;  %v1924_v45 = vld [vmem:[%s3139_s6 + $0x1] ss:$0 sm:$0xff] }
 0x408   : > { %v1099_v53 = vsel %vm2558_vm4, %v1094_v51, 0.0  ;;  %v2102_v54 = vpop.f32.mrf.mxu0  ;;  %v1116_v55 = vld [vmem:[#allocation3 + $0x2] sm:$0xff]  ;;  %2135 = vmatpush3.msra.mxu0 %v1928_v39 }
 0x409   : > { %v1112_v56 = vld [vmem:[#allocation3 + $0x9] sm:$0xff]  ;;  %1104 = vst.msk [vmem:[#allocation3 + $0x19] sm:$0xff] %vm462_vm3, %v1099_v53  ;;  %vm1085_vm14 = vcmp.ge.f32.partialorder %v1078_v52, 0.0  ;;  %v1090_v57 = vmul.f32 0.1, %v1078_v52  ;;  %1146 = vrot.lane.b32.xlu1 %v1116_v55, %s2360_s18  ;;  %2136 = vmatprep.subr.mxu0 %v2357_v3 }
 0x40a   : > { %1128 = vrot.lane.b32.xlu0 %v1112_v56, %s2359_s10  ;;  %v1107_v10 = vld [vmem:[#allocation3 + $0x8] sm:$0xff]  ;;  %2137 = vmatpush3.msra.mxu0 %v1927_v40 }
 0x40b   : > { %v1095_v58 = vsel %vm1085_vm14, %v1078_v52, %v1090_v57  ;;  %2138 = vmatprep.subr.mxu0 %v2357_v3  ;;  %v1925_v50 = vld [vmem:[%s3136_s3 + $0x60] sm:$0xff] }
 0x40c   : > { %v1100_v59 = vsel %vm2566_vm8, %v1095_v58, 0.0  ;;  %v1117_v60 = vld [vmem:[#allocation3 + $0xa] sm:$0xff]  ;;  %2139 = vmatpush3.msra.mxu0 %v1926_v42 }
 0x40d   : > { %v1113_v61 = vld [vmem:[#allocation3 + $0x11] sm:$0xff]  ;;  %1105 = vst.msk [vmem:[#allocation3 + $0x21] sm:$0xff] %vm462_vm3, %v1100_v59  ;;  %1148 = vrot.lane.b32.xlu1 %v1117_v60, %s2360_s18  ;;  %2140 = vmatprep.subr.mxu0 %v2357_v3 }
 0x40e   : > { %1130 = vrot.lane.b32.xlu0 %v1113_v61, %s2359_s10  ;;  %v1108_v17 = vld [vmem:[#allocation3 + $0x10] sm:$0xff]  ;;  %2141 = vmatpush3.msra.mxu0 %v1925_v50 }
 0x410   : > { %v1118_v62 = vld [vmem:[#allocation3 + $0x12] sm:$0xff] }
 0x411   : > { %v1114_v0 = vld [vmem:[#allocation3 + $0x19] sm:$0xff]  ;;  %1150 = vrot.lane.b32.xlu1 %v1118_v62, %s2360_s18 }
 0x412   : > { %1132 = vrot.lane.b32.xlu0 %v1114_v0, %s2359_s10  ;;  %v1109_v23 = vld [vmem:[#allocation3 + $0x18] sm:$0xff] }
 0x414   : > { %v1119_v1 = vld [vmem:[#allocation3 + $0x1a] sm:$0xff]  ;;  %v1120_v4 = vld [vmem:[#allocation3 + $0x22] sm:$0xff] }
 0x415   : > { %v1115_v2 = vld [vmem:[#allocation3 + $0x21] sm:$0xff]  ;;  %1152 = vrot.lane.b32.xlu1 %v1119_v1, %s2360_s18 }
 0x416   : > { %1134 = vrot.lane.b32.xlu0 %v1115_v2, %s2359_s10  ;;  %v1110_v28 = vld [vmem:[#allocation3 + $0x20] sm:$0xff] }
 0x419   : > { %1154 = vrot.lane.b32.xlu1 %v1120_v4, %s2360_s18 }
 0x477   : > { %v1127_v5 = vpop.permute.xlu0 %1126 }
 0x478   : > { %v1161_v7 = vsel %vm462_vm3, %v1106_v15, %v1127_v5 }
 0x47b   : > { %v1147_v8 = vpop.permute.xlu1 %1146 }
 0x47c   : > { %v1129_v9 = vpop.permute.xlu0 %1128  ;;  %v1166_v34 = vsel %vm528_vm10, %v1161_v7, %v1147_v8 }
 0x47d   : > { %2116 = vmatmul.mubr.msk.f32.vlgmr.msra.gmra.mxu1 %vm547_vm11, %v1166_v34  ;;  %v1162_v11 = vsel %vm462_vm3, %v1107_v10, %v1129_v9 }
 0x47e   : > { %2118 = vmatprep.mubr.msk.f32.mxu1 %vm2358_vm9, %v2357_v3 }
 0x47f   : > { %v1149_v13 = vpop.permute.xlu1 %1148 }
 0x480   : > { %v1131_v14 = vpop.permute.xlu0 %1130  ;;  %v1167_v16 = vsel %vm528_vm10, %v1162_v11, %v1149_v13 }
 0x481   : > { %2119 = vmatmul.mubr.msk.f32.gmra.mxu1 %vm547_vm11, %v1167_v16  ;;  %v1163_v18 = vsel %vm462_vm3, %v1108_v17, %v1131_v14 }
 0x482   : > { %2121 = vmatprep.mubr.msk.f32.mxu1 %vm2358_vm9, %v2357_v3 }
 0x483   : > { %v1151_v35 = vpop.permute.xlu1 %1150 }
 0x484   : > { %v1133_v20 = vpop.permute.xlu0 %1132  ;;  %v1168_v22 = vsel %vm528_vm10, %v1163_v18, %v1151_v35 }
 0x485   : > { %2122 = vmatmul.mubr.msk.f32.gmra.mxu1 %vm547_vm11, %v1168_v22  ;;  %v1164_v24 = vsel %vm462_vm3, %v1109_v23, %v1133_v20 }
 0x486   : > { %2124 = vmatprep.mubr.msk.f32.mxu1 %vm2358_vm9, %v2357_v3 }
 0x487   : > { %v1153_v25 = vpop.permute.xlu1 %1152 }
 0x488   : > { %v1169_v37 = vsel %vm528_vm10, %v1164_v24, %v1153_v25  ;;  %v1135_v26 = vpop.permute.xlu0 %1134 }
 0x489   : > { %2125 = vmatmul.mubr.msk.f32.gmra.mxu1 %vm547_vm11, %v1169_v37  ;;  %v1165_v29 = vsel %vm462_vm3, %v1110_v28, %v1135_v26 }
 0x48a   : > { %2127 = vmatprep.mubr.msk.f32.mxu1 %vm2358_vm9, %v2357_v3 }
 0x48b   : > { %v1155_v30 = vpop.permute.xlu1 %1154 }
 0x48c   : > { %v1170_v31 = vsel %vm528_vm10, %v1165_v29, %v1155_v30 }
 0x48d   : > { %2128 = vmatmul.mubr.msk.f32.gmra.mxu1 %vm547_vm11, %v1170_v31 }
 0x48e   : > { %2169 = vmatprep.mubr.msk.f32.mxu1 %vm2358_vm9, %v2357_v3 }
 0x53d   : > { %v1259_v44 = vpop.f32.mrf.mxu1 }
 0x53e   : > { %v1283_v46 = vadd.f32 %v1259_v44, %v2733_v63 }
 0x53f   : > { %v2117_v47 = vpop.f32.mrf.mxu1 }
 0x540   : > { %v1296_v48 = vadd.f32 %v1924_v45, %v1283_v46 }
 0x541   : > { %v1264_v49 = vpop.f32.mrf.mxu1 }
 0x542   : > { %vm1301_vm15 = vcmp.ge.f32.partialorder %v1296_v48, 0.0  ;;  %v1306_v51 = vmul.f32 0.1, %v1296_v48  ;;  %v1284_v52 = vadd.f32 %v1264_v49, %v2743_v6 }
 0x543   : > { %v2120_v53 = vpop.f32.mrf.mxu1 }
 0x544   : > { %v1311_v54 = vsel %vm1301_vm15, %v1296_v48, %v1306_v51  ;;  %v2921_v55 = vadd.f32 %v1924_v45, %v1284_v52 }
 0x545   : > { %v1316_v56 = vsel %vm2507_vm7, %v1311_v54, 0.0  ;;  %v1269_v63 = vpop.f32.mrf.mxu1 }
 0x546   : > { %1321 = vst.msk [vmem:[#allocation2 + $0x5] sm:$0xff] %vm462_vm3, %v1316_v56  ;;  %vm1302_vm1 = vcmp.ge.f32.partialorder %v2921_v55, 0.0  ;;  %v1307_v57 = vmul.f32 0.1, %v2921_v55  ;;  %v1285_v58 = vadd.f32 %v1269_v63, %v2752_v12 }
 0x547   : > { %v2123_v59 = vpop.f32.mrf.mxu1 }
 0x548   : > { %v1312_v6 = vsel %vm1302_vm1, %v2921_v55, %v1307_v57  ;;  %v2930_v60 = vadd.f32 %v1924_v45, %v1285_v58  ;;  %v1943_v58 = vld [vmem:[%s3138_s5 + $0x88] sm:$0xff]  ;;  %v1942_v59 = vld [vmem:[%s3138_s5 + $0x80] sm:$0xff] }
 0x549   : > { %v1317_v61 = vsel %vm2524_vm13, %v1312_v6, 0.0  ;;  %v1274_v62 = vpop.f32.mrf.mxu1  ;;  %2158 = vmatpush3.msra.mxu1 %v1943_v58  ;;  %v1941_v6 = vld [vmem:[%s3138_s5 + $0x78] sm:$0xff] }
 0x54a   : > { %1322 = vst.msk [vmem:[#allocation2 + $0xd] sm:$0xff] %vm462_vm3, %v1317_v61  ;;  %vm1303_vm2 = vcmp.ge.f32.partialorder %v2930_v60, 0.0  ;;  %v1308_v0 = vmul.f32 0.1, %v2930_v60  ;;  %v1286_v1 = vadd.f32 %v1274_v62, %v2761_v19  ;;  %2159 = vmatprep.subr.mxu1 %v2357_v3  ;;  %v1940_v61 = vld [vmem:[%s3138_s5 + $0x70] sm:$0xff]  ;;  %v1939_v62 = vld [vmem:[%s3138_s5 + $0x68] sm:$0xff] }
 0x54b   : > { %v2126_v2 = vpop.f32.mrf.mxu1  ;;  %2160 = vmatpush3.msra.mxu1 %v1942_v59 }
 0x54c   : > { %v1313_v12 = vsel %vm1303_vm2, %v2930_v60, %v1308_v0  ;;  %v2939_v4 = vadd.f32 %v1924_v45, %v1286_v1  ;;  %2161 = vmatprep.subr.mxu1 %v2357_v3  ;;  %v1932_v0 = vld [vmem:[%s3137_s4 + $0x2] ss:$0 sm:$0xff] }
 0x54d   : > { %v1318_v5 = vsel %vm2540_vm0, %v1313_v12, 0.0  ;;  %v1279_v15 = vpop.f32.mrf.mxu1  ;;  %v1331_v7 = vld [vmem:[#allocation2 + $0x5] sm:$0xff]  ;;  %2162 = vmatpush3.msra.mxu1 %v1941_v6 }
 0x54e   : > { %1323 = vst.msk [vmem:[#allocation2 + $0x15] sm:$0xff] %vm462_vm3, %v1318_v5  ;;  %vm1304_vm5 = vcmp.ge.f32.partialorder %v2939_v4, 0.0  ;;  %v1309_v8 = vmul.f32 0.1, %v2939_v4  ;;  %v1287_v9 = vadd.f32 %v1279_v15, %v2771_v27  ;;  %1346 = vrot.lane.b32.xlu0 %v1331_v7, %s2359_s10  ;;  %v1326_v26 = vld [vmem:[#allocation2] sm:$0xff]  ;;  %2163 = vmatprep.subr.mxu1 %v2357_v3 }
 0x54f   : > { %v2129_v19 = vpop.f32.mrf.mxu1  ;;  %2164 = vmatpush3.msra.mxu1 %v1940_v61  ;;  %v1938_v5 = vld [vmem:[%s3138_s5 + $0x60] sm:$0xff] }
 0x550   : > { %v1314_v34 = vsel %vm1304_vm5, %v2939_v4, %v1309_v8  ;;  %v1300_v10 = vadd.f32 %v1924_v45, %v1287_v9  ;;  %2165 = vmatprep.subr.mxu1 %v2357_v3 }
 0x551   : > { %v1319_v11 = vsel %vm2558_vm4, %v1314_v34, 0.0  ;;  %v1336_v13 = vld [vmem:[#allocation2 + $0xa] sm:$0xff]  ;;  %2166 = vmatpush3.msra.mxu1 %v1939_v62 }
 0x552   : > { %v1332_v14 = vld [vmem:[#allocation2 + $0xd] sm:$0xff]  ;;  %1324 = vst.msk [vmem:[#allocation2 + $0x1d] sm:$0xff] %vm462_vm3, %v1319_v11  ;;  %vm1305_vm6 = vcmp.ge.f32.partialorder %v1300_v10, 0.0  ;;  %v1310_v16 = vmul.f32 0.1, %v1300_v10  ;;  %1366 = vrot.lane.b32.xlu1 %v1336_v13, %s2360_s18  ;;  %2167 = vmatprep.subr.mxu1 %v2357_v3 }
 0x553   : > { %1348 = vrot.lane.b32.xlu0 %v1332_v14, %s2359_s10  ;;  %v1327_v33 = vld [vmem:[#allocation2 + $0x8] sm:$0xff]  ;;  %2168 = vmatpush3.msra.mxu1 %v1938_v5 }
 0x554   : > { %v1315_v27 = vsel %vm1305_vm6, %v1300_v10, %v1310_v16 }
 0x555   : > { %v1320_v17 = vsel %vm2566_vm8, %v1315_v27, 0.0  ;;  %v1337_v18 = vld [vmem:[#allocation2 + $0x12] sm:$0xff] }
 0x556   : > { %v1333_v35 = vld [vmem:[#allocation2 + $0x15] sm:$0xff]  ;;  %1325 = vst.msk [vmem:[#allocation2 + $0x25] sm:$0xff] %vm462_vm3, %v1320_v17  ;;  %1368 = vrot.lane.b32.xlu1 %v1337_v18, %s2360_s18 }
 0x557   : > { %1350 = vrot.lane.b32.xlu0 %v1333_v35, %s2359_s10  ;;  %v1328_v44 = vld [vmem:[#allocation2 + $0x10] sm:$0xff] }
 0x559   : > { %v1338_v20 = vld [vmem:[#allocation2 + $0x1a] sm:$0xff] }
 0x55a   : > { %v1334_v22 = vld [vmem:[#allocation2 + $0x1d] sm:$0xff]  ;;  %1370 = vrot.lane.b32.xlu1 %v1338_v20, %s2360_s18 }
 0x55b   : > { %1352 = vrot.lane.b32.xlu0 %v1334_v22, %s2359_s10  ;;  %v1329_v49 = vld [vmem:[#allocation2 + $0x18] sm:$0xff] }
 0x55d   : > { %v1339_v23 = vld [vmem:[#allocation2 + $0x22] sm:$0xff]  ;;  %v1340_v25 = vld [vmem:[#allocation2 + $0x2a] sm:$0xff] }
 0x55e   : > { %v1335_v24 = vld [vmem:[#allocation2 + $0x25] sm:$0xff]  ;;  %1372 = vrot.lane.b32.xlu1 %v1339_v23, %s2360_s18 }
 0x55f   : > { %1354 = vrot.lane.b32.xlu0 %v1335_v24, %s2359_s10  ;;  %v1330_v54 = vld [vmem:[#allocation2 + $0x20] sm:$0xff] }
 0x562   : > { %1374 = vrot.lane.b32.xlu1 %v1340_v25, %s2360_s18 }
 0x5c0   : > { %v1347_v37 = vpop.permute.xlu0 %1346 }
 0x5c1   : > { %v1381_v28 = vsel %vm462_vm3, %v1326_v26, %v1347_v37 }
 0x5c4   : > { %v1367_v29 = vpop.permute.xlu1 %1366 }
 0x5c5   : > { %v1349_v30 = vpop.permute.xlu0 %1348  ;;  %v1386_v31 = vsel %vm528_vm10, %v1381_v28, %v1367_v29 }
 0x5c6   : > { %2143 = vmatmul.mubr.msk.f32.vlgmr.msra.gmra.mxu0 %vm547_vm11, %v1386_v31  ;;  %v1382_v38 = vsel %vm462_vm3, %v1327_v33, %v1349_v30 }
 0x5c7   : > { %2145 = vmatprep.mubr.msk.f32.mxu0 %vm2358_vm9, %v2357_v3 }
 0x5c8   : > { %v1369_v39 = vpop.permute.xlu1 %1368 }
 0x5c9   : > { %v1351_v40 = vpop.permute.xlu0 %1350  ;;  %v1387_v42 = vsel %vm528_vm10, %v1382_v38, %v1369_v39 }
 0x5ca   : > { %2146 = vmatmul.mubr.msk.f32.gmra.mxu0 %vm547_vm11, %v1387_v42  ;;  %v1383_v45 = vsel %vm462_vm3, %v1328_v44, %v1351_v40 }
 0x5cb   : > { %2148 = vmatprep.mubr.msk.f32.mxu0 %vm2358_vm9, %v2357_v3 }
 0x5cc   : > { %v1371_v46 = vpop.permute.xlu1 %1370 }
 0x5cd   : > { %v1353_v47 = vpop.permute.xlu0 %1352  ;;  %v1388_v48 = vsel %vm528_vm10, %v1383_v45, %v1371_v46 }
 0x5ce   : > { %2149 = vmatmul.mubr.msk.f32.gmra.mxu0 %vm547_vm11, %v1388_v48  ;;  %v1384_v50 = vsel %vm462_vm3, %v1329_v49, %v1353_v47 }
 0x5cf   : > { %2151 = vmatprep.mubr.msk.f32.mxu0 %vm2358_vm9, %v2357_v3 }
 0x5d0   : > { %v1373_v51 = vpop.permute.xlu1 %1372 }
 0x5d1   : > { %v1389_v52 = vsel %vm528_vm10, %v1384_v50, %v1373_v51  ;;  %v1355_v53 = vpop.permute.xlu0 %1354 }
 0x5d2   : > { %2152 = vmatmul.mubr.msk.f32.gmra.mxu0 %vm547_vm11, %v1389_v52  ;;  %v1385_v56 = vsel %vm462_vm3, %v1330_v54, %v1355_v53 }
 0x5d3   : > { %2154 = vmatprep.mubr.msk.f32.mxu0 %vm2358_vm9, %v2357_v3 }
 0x5d4   : > { %v1375_v63 = vpop.permute.xlu1 %1374 }
 0x5d5   : > { %v1390_v57 = vsel %vm528_vm10, %v1385_v56, %v1375_v63 }
 0x5d6   : > { %2155 = vmatmul.mubr.msk.f32.gmra.mxu0 %vm547_vm11, %v1390_v57 }
 0x686   : > { %v1487_v1 = vpop.f32.mrf.mxu0 }
 0x687   : > { %v1488_v2 = vadd.f32 %v1932_v0, %v1487_v1 }
 0x688   : > { %v2144_v12 = vpop.f32.mrf.mxu0 }
 0x689   : > { %vm1511_vm12 = vcmp.ge.f32.partialorder %v1488_v2, 0.0  ;;  %v1516_v15 = vmul.f32 0.1, %v1488_v2 }
 0x68a   : > { %v1492_v7 = vpop.f32.mrf.mxu0 }
 0x68b   : > { %v1521_v8 = vsel %vm1511_vm12, %v1488_v2, %v1516_v15  ;;  %v1493_v9 = vadd.f32 %v1932_v0, %v1492_v7 }
 0x68c   : > { %v1526_v19 = vsel %vm2507_vm7, %v1521_v8, 0.0  ;;  %v2147_v34 = vpop.f32.mrf.mxu0 }
 0x68d   : > { %1531 = vst.msk [vmem:[#allocation3 + $0x1] sm:$0xff] %vm462_vm3, %v1526_v19  ;;  %vm1512_vm14 = vcmp.ge.f32.partialorder %v1493_v9, 0.0  ;;  %v1517_v10 = vmul.f32 0.1, %v1493_v9  ;;  %v1950_v34 = vld [vmem:[%s3139_s6 + $0x2] ss:$0 sm:$0xff] }
 0x68e   : > { %v1497_v11 = vpop.f32.mrf.mxu0 }
 0x68f   : > { %v1522_v13 = vsel %vm1512_vm14, %v1493_v9, %v1517_v10  ;;  %v1498_v14 = vadd.f32 %v1932_v0, %v1497_v11 }
 0x690   : > { %v1527_v16 = vsel %vm2524_vm13, %v1522_v13, 0.0  ;;  %v2150_v27 = vpop.f32.mrf.mxu0 }
 0x691   : > { %1532 = vst.msk [vmem:[#allocation3 + $0x9] sm:$0xff] %vm462_vm3, %v1527_v16  ;;  %vm1513_vm15 = vcmp.ge.f32.partialorder %v1498_v14, 0.0  ;;  %v1518_v17 = vmul.f32 0.1, %v1498_v14 }
 0x692   : > { %v1502_v18 = vpop.f32.mrf.mxu0 }
 0x693   : > { %v1523_v35 = vsel %vm1513_vm15, %v1498_v14, %v1518_v17  ;;  %v1503_v21 = vadd.f32 %v1932_v0, %v1502_v18 }
 0x694   : > { %v1528_v20 = vsel %vm2540_vm0, %v1523_v35, 0.0  ;;  %v2153_v22 = vpop.f32.mrf.mxu0  ;;  %v1541_v23 = vld [vmem:[#allocation3 + $0x1] sm:$0xff]  ;;  %vm1725_vm0 = vcmask 130052  }
 0x695   : > { %1533 = vst.msk [vmem:[#allocation3 + $0x11] sm:$0xff] %vm462_vm3, %v1528_v20  ;;  %vm1514_vm7 = vcmp.ge.f32.partialorder %v1503_v21, 0.0  ;;  %v1519_v24 = vmul.f32 0.1, %v1503_v21  ;;  %1556 = vrot.lane.b32.xlu0 %v1541_v23, %s2359_s10  ;;  %v1536_v46 = vld [vmem:[#allocation3] sm:$0xff] }
 0x696   : > { %v1507_v32 = vpop.f32.mrf.mxu0 }
 0x697   : > { %v1524_v25 = vsel %vm1514_vm7, %v1503_v21, %v1519_v24  ;;  %v1508_v37 = vadd.f32 %v1932_v0, %v1507_v32 }
 0x698   : > { %v1529_v26 = vsel %vm2558_vm4, %v1524_v25, 0.0  ;;  %v2156_v28 = vpop.f32.mrf.mxu0  ;;  %v1546_v29 = vld [vmem:[#allocation3 + $0x2] sm:$0xff]  ;;  %vm1728_vm4 = vcmask 125952  }
 0x699   : > { %v1542_v30 = vld [vmem:[#allocation3 + $0x9] sm:$0xff]  ;;  %1534 = vst.msk [vmem:[#allocation3 + $0x19] sm:$0xff] %vm462_vm3, %v1529_v26  ;;  %vm1515_vm13 = vcmp.ge.f32.partialorder %v1508_v37, 0.0  ;;  %v1520_v36 = vmul.f32 0.1, %v1508_v37  ;;  %1576 = vrot.lane.b32.xlu1 %v1546_v29, %s2360_s18 }
 0x69a   : > { %1558 = vrot.lane.b32.xlu0 %v1542_v30, %s2359_s10  ;;  %v1537_v51 = vld [vmem:[#allocation3 + $0x8] sm:$0xff] }
 0x69b   : > { %v1525_v31 = vsel %vm1515_vm13, %v1508_v37, %v1520_v36 }
 0x69c   : > { %v1530_v33 = vsel %vm2566_vm8, %v1525_v31, 0.0  ;;  %v1547_v38 = vld [vmem:[#allocation3 + $0xa] sm:$0xff] }
 0x69d   : > { %v1543_v39 = vld [vmem:[#allocation3 + $0x11] sm:$0xff]  ;;  %1535 = vst.msk [vmem:[#allocation3 + $0x21] sm:$0xff] %vm462_vm3, %v1530_v33  ;;  %1578 = vrot.lane.b32.xlu1 %v1547_v38, %s2360_s18 }
 0x69e   : > { %1560 = vrot.lane.b32.xlu0 %v1543_v39, %s2359_s10  ;;  %v1538_v63 = vld [vmem:[#allocation3 + $0x10] sm:$0xff] }
 0x6a0   : > { %v1548_v41 = vld [vmem:[#allocation3 + $0x12] sm:$0xff] }
 0x6a1   : > { %v1544_v40 = vld [vmem:[#allocation3 + $0x19] sm:$0xff]  ;;  %1580 = vrot.lane.b32.xlu1 %v1548_v41, %s2360_s18 }
 0x6a2   : > { %1562 = vrot.lane.b32.xlu0 %v1544_v40, %s2359_s10  ;;  %v1539_v61 = vld [vmem:[#allocation3 + $0x18] sm:$0xff] }
 0x6a4   : > { %v1549_v42 = vld [vmem:[#allocation3 + $0x1a] sm:$0xff]  ;;  %v1550_v43 = vld [vmem:[#allocation3 + $0x22] sm:$0xff] }
 0x6a5   : > { %v1545_v44 = vld [vmem:[#allocation3 + $0x21] sm:$0xff]  ;;  %1582 = vrot.lane.b32.xlu1 %v1549_v42, %s2360_s18 }
 0x6a6   : > { %1564 = vrot.lane.b32.xlu0 %v1545_v44, %s2359_s10  ;;  %v1540_v12 = vld [vmem:[#allocation3 + $0x20] sm:$0xff]  ;;  %s343_s10 = sand.u32 1, %s2331_s25  }
 0x6a7   : > { %s3082_s22 = scalar_lea.sflag [#allocation5], %s343_s10 }
 0x6a9   : > { %1584 = vrot.lane.b32.xlu1 %v1550_v43, %s2360_s18  ;;  %s1878_s18 = sshll.u32 %s343_s10, 4 }
 0x6aa   : > { %s345_s12 = scalar_lea.vmem [#allocation4], %s1878_s18 }
 0x6ab   : > { %s1746_s21 = sshll.u32 %s345_s12, 4  ;;  %s3073_s21 = int_to_ptr.vmem [resolvable:$true] %s1746_s21 }
 0x6ac   : > { %s2263_s18 = scalar_lea.vmem %s3073_s21, 256  ;;  %p2270_p4 = scmp.lt.s32.totalorder %s3073_s21, %s2268_s16 }
 0x6ad   : > { %p2264_p0 = scmp.ne.s32.totalorder %s3073_s21, %s2263_s18  ;;  %p2271_p5 = scmp.lt.s32.totalorder %s2269_s17, %s2263_s18 }
 0x6af   : > { %p2265_p1 = pnand %p2264_p0, %p2455_p3  ;;  %p2272_p6 = por %p2271_p5, %p2270_p4 }
 0x6b1   : > { %p2266_p2 = pneg %p2265_p1 }
 0x6b3   : > { %p2273_p7 = pnand %p2272_p6, %p2266_p2 }
 0x707   : > { %v1557_v45 = vpop.permute.xlu0 %1556 }
 0x708   : > { %v1591_v47 = vsel %vm462_vm3, %v1536_v46, %v1557_v45 }
 0x70b   : > { %v1577_v48 = vpop.permute.xlu1 %1576 }
 0x70c   : > { %v1559_v49 = vpop.permute.xlu0 %1558  ;;  %v1596_v50 = vsel %vm528_vm10, %v1591_v47, %v1577_v48 }
 0x70d   : > { %2170 = vmatmul.mubr.msk.f32.vlgmr.msra.gmra.mxu1 %vm547_vm11, %v1596_v50  ;;  %v1592_v52 = vsel %vm462_vm3, %v1537_v51, %v1559_v49 }
 0x70e   : > { %2172 = vmatprep.mubr.msk.f32.mxu1 %vm2358_vm9, %v2357_v3 }
 0x70f   : > { %v1579_v53 = vpop.permute.xlu1 %1578 }
 0x710   : > { %v1561_v54 = vpop.permute.xlu0 %1560  ;;  %v1597_v56 = vsel %vm528_vm10, %v1592_v52, %v1579_v53 }
 0x711   : > { %2173 = vmatmul.mubr.msk.f32.gmra.mxu1 %vm547_vm11, %v1597_v56  ;;  %v1593_v57 = vsel %vm462_vm3, %v1538_v63, %v1561_v54 }
 0x712   : > { %2175 = vmatprep.mubr.msk.f32.mxu1 %vm2358_vm9, %v2357_v3 }
 0x713   : > { %v1581_v58 = vpop.permute.xlu1 %1580 }
 0x714   : > { %v1563_v59 = vpop.permute.xlu0 %1562  ;;  %v1598_v6 = vsel %vm528_vm10, %v1593_v57, %v1581_v58 }
 0x715   : > { %2176 = vmatmul.mubr.msk.f32.gmra.mxu1 %vm547_vm11, %v1598_v6  ;;  %v1594_v62 = vsel %vm462_vm3, %v1539_v61, %v1563_v59 }
 0x716   : > { %2178 = vmatprep.mubr.msk.f32.mxu1 %vm2358_vm9, %v2357_v3 }
 0x717   : > { %v1583_v0 = vpop.permute.xlu1 %1582 }
 0x718   : > { %v1599_v1 = vsel %vm528_vm10, %v1594_v62, %v1583_v0  ;;  %v1565_v2 = vpop.permute.xlu0 %1564 }
 0x719   : > { %2179 = vmatmul.mubr.msk.f32.gmra.mxu1 %vm547_vm11, %v1599_v1  ;;  %v1595_v5 = vsel %vm462_vm3, %v1540_v12, %v1565_v2 }
 0x71a   : > { %2181 = vmatprep.mubr.msk.f32.mxu1 %vm2358_vm9, %v2357_v3 }
 0x71b   : > { %v1585_v15 = vpop.permute.xlu1 %1584 }
 0x71c   : > { %v1600_v7 = vsel %vm528_vm10, %v1595_v5, %v1585_v15 }
 0x71d   : > { %2182 = vmatmul.mubr.msk.f32.gmra.mxu1 %vm547_vm11, %v1600_v7 }
 0x7cd   : > { %v1689_v8 = vpop.f32.mrf.mxu1 }
 0x7cf   : > { %v2171_v9 = vpop.f32.mrf.mxu1 }
 0x7d1   : > { %v1693_v19 = vpop.f32.mrf.mxu1 }
 0x7d2   : > { %v1711_v3 = vadd.f32 %v1693_v19, %v2921_v55 }
 0x7d3   : > { %v2174_v10 = vpop.f32.mrf.mxu1 }
 0x7d4   : > { %v1722_v11 = vadd.f32 %v1950_v34, %v1711_v3 }
 0x7d5   : > { %v1698_v13 = vpop.f32.mrf.mxu1 }
 0x7d6   : > { %1726 = vst.msk [vmem:[%s345_s12 - $0x4] sm:$0xf0] %vm1725_vm0, %v1722_v11  ;;  %v1712_v14 = vadd.f32 %v1698_v13, %v2930_v60 }
 0x7d7   : > { %v2177_v16 = vpop.f32.mrf.mxu1 }
 0x7d8   : > { %v1723_v27 = vadd.f32 %v1950_v34, %v1712_v14 }
 0x7d9   : > { %v1703_v17 = vpop.f32.mrf.mxu1 }
 0x7da   : > { %1727 = vst.msk [vmem:[%s345_s12 + $0x4] sm:$0xff] %vm462_vm3, %v1723_v27  ;;  %v1713_v55 = vadd.f32 %v1703_v17, %v2939_v4 }
 0x7db   : > { %v2180_v18 = vpop.f32.mrf.mxu1 }
 0x7dc   : > { %v1724_v60 = vadd.f32 %v1950_v34, %v1713_v55 }
 0x7dd   : > { %v1708_v35 = vpop.f32.mrf.mxu1 }
 0x7de   : > { %1729 = vst.msk [vmem:[%s345_s12 + $0xc] sm:$0xf] %vm1728_vm4, %v1724_v60 }
 0x7df   : > { %v2183_v21 = vpop.f32.mrf.mxu1 }
 0x7e0   : > { %2276 = shalt.err (!%p2273_p7)
}
 0x7e1   : > { %s2277_s10 = scalar_lea.hbm %s3078_s23, 256  ;;  %s2281_s12 = scalar_lea.hbm %s3140_s7, 1536 }
 0x7e2   : > { %p2278_p9 = scmp.ne.s32.totalorder %s3078_s23, %s2277_s10  ;;  %p2282_p12 = scmp.lt.s32.totalorder %s3078_s23, %s3140_s7 }
 0x7e3   : > { %p2283_p13 = scmp.lt.s32.totalorder %s2281_s12, %s2277_s10 }
 0x7e4   : > { %p2279_p10 = pnand %p2278_p9, %p2455_p3 }
 0x7e5   : > { %p2284_p0 = por %p2283_p13, %p2282_p12 }
 0x7e6   : > { %p2280_p11 = pneg %p2279_p10 }
 0x7e8   : > { %p2285_p1 = pnand %p2284_p0, %p2280_p11 }
 0x7ea   : > { %2288 = shalt.err (!%p2285_p1)
}
 0x7eb   : > { %s2362_s28 = smov 128   ;;  %s2363_s18 = smov 8  }
 0x7ec   : > { %2186 = dma.vmem_to_hbm [thread:$0]  (%p2455_p3), %s3073_s21, 256, %s3078_s23, %s3082_s22, %s2362_s28, %s2362_s28, %s2363_s18  }
 0x7ed PF: > { %p2192_p2 = scmp.ge.s32.totalorder %s2355_s8, 2  ;;  %s1761_s13 = sand.u32 1, %s2327_s24  }
 0x7ee   : > { %s1762_s16 = scalar_lea.sflag [#allocation5], %s1761_s13 }
 0x7ef   : > { %p2189_p4 = pnand %p2192_p2, %p2464_p8 }
 0x7f1   : > { %p2190_p5 = pneg %p2189_p4 }
 0x7f3   : > { %2322 = dma.done.wait (%p2190_p5), %s1762_s16, 256  }
 0x7f4   : > { %2324 = vsyncadd (%p2190_p5), %s1762_s16, 4294967040  ;;  %s20_s8 = sadd.s32 1, %s2355_s8   ;;  %s3157_s14 = sld [smem:[#allocation7_spill]] }
 0x7f5   : > { %p17_p6 = scmp.ge.s32.totalorder %s20_s8, 8   ;;  %s3158_s21 = sld [smem:[#allocation8_spill]] }
 0x7f6   : > { %s3159_s24 = smov %s2331_s25  ;;  %s3160_s25 = smov %s2335_s26 }
 0x7f7   : > { %s3161_s26 = smov %s2473_s19  ;;  %s3162_s27 = smov %s2347_s29 }
 0x7f8   : > { %s3163_s28 = smov %s2351_s30  ;;  %19 = sbr.rel (!%p17_p6) target bundleno = 5 (0x5), region = 97 }
 0x7fa   : > { %s3164_s29 = smov %s3157_s14 }
 0x7fb   : > { %s3165_s30 = smov %s3158_s21 }
 0x7fd   :  { %1767 = vsyncpa [#allocation5], 1 }
 0x7fe   :  { %1769 = vsyncpa [#allocation5 + $0x1], 1 }

</bundles_post_ra>
